<compile_context>
chip_gen: v7x
topology: tpu7x:2x2x1
jax: 0.10.0
libtpu: 0.0.40
codegen_flags: <defaults>
</compile_context>

<pallas_src>
import jax
import jax.numpy as jnp
from jax import lax
from jax.experimental import pallas as pl
from jax.experimental.pallas import tpu as pltpu

# ---------------- small hyperparameters ----------------
N_CHAN = 4          # EEG channels
SEQ    = 16         # sequence length
HIDDEN = 32         # LSTM hidden size
CNN_F  = 8          # hidden conv filters
KSIZE  = 3          # conv kernel size along time
B_TILE = 8          # batch tile per grid step (8 => sublane-aligned row groups)


# ---------------- Pallas kernel (one batch tile per grid step) ----------------
def parallel_cnn_lstm_kernel(
    x_ref,      # (SEQ*B_TILE, KSIZE*N_CHAN)  im2col input, row = t*B_TILE + b     VMEM
    wcomb_ref,  # (KSIZE*N_CHAN, 4H + FN)     fused [W_ih (center tap) | conv1]    VMEM
    bcomb_ref,  # (1, 4H + FN)                fused [b_gates | conv1 bias]         VMEM
    whh_ref,    # (H, 4H)                     gate order [i, f, o | g]             VMEM
    wout_ref,   # (H, N_CHAN)                                                      VMEM
    bout_ref,   # (1, N_CHAN)                                                      VMEM
    w2mat_ref,  # (KSIZE, FN, N_CHAN)         conv2 taps as matmuls (folds F-red.) VMEM
    b2row_ref,  # (1, N_CHAN)                                                      VMEM
    wcat0_ref,  # (SEQ*B_TILE, N_CHAN)        shared across grid tiles             VMEM
    wcat1_ref,  # (SEQ*B_TILE, N_CHAN)        shared across grid tiles             VMEM
    out_ref,    # (SEQ*B_TILE, N_CHAN)                                             VMEM
):
    H = HIDDEN
    FN = CNN_F * N_CHAN
    Bt = x_ref.shape[0] // SEQ
    SB = SEQ * Bt

    # ---- fused: LSTM input projection + conv layer 1 (one MXU push) ----
    y = (jnp.dot(x_ref[...], wcomb_ref[...], preferred_element_type=jnp.float32)
         + bcomb_ref[...])                               # (SB, 4H + FN)
    gx = y[:, :4 * H]                                    # (SB, 4H) pre-gates (x part)
    h1 = jnp.maximum(y[:, 4 * H:], 0.0)                  # (SB, FN) conv1 + ReLU

    # ---- LSTM recurrence: batched over the tile, serial over time, all SSA ----
    whh = whh_ref[...]
    h = jnp.zeros((Bt, H), jnp.float32)
    c = jnp.zeros((Bt, H), jnp.float32)
    hs = []
    for t in range(SEQ):                                 # static unroll, static slices
        gates = gx[t * Bt:(t + 1) * Bt, :] + jnp.dot(
            h, whh, preferred_element_type=jnp.float32)  # (Bt, 4H), order [i,f,o|g]
        sig = jax.nn.sigmoid(gates[:, :3 * H])           # one 96-lane sigmoid
        g = jnp.tanh(gates[:, 3 * H:])                   # one 32-lane tanh
        i_g = sig[:, 0:H]
        f_g = sig[:, H:2 * H]
        o_g = sig[:, 2 * H:3 * H]
        c = f_g * c + i_g * g
        h = o_g * jnp.tanh(c)
        hs.append(h)
    hall = jnp.concatenate(hs, axis=0)                   # (SB, H)

    # Hoisted output projection: single (SB, H) @ (H, N_CHAN) matmul + bias.
    lstm_y = (jnp.dot(hall, wout_ref[...], preferred_element_type=jnp.float32)
              + bout_ref[...])                           # (SB, N_CHAN)

    # ---- conv layer 2: 3 tap matmuls on statically shifted slabs of h1 ----
    zrow = jnp.zeros((Bt, FN), jnp.float32)
    h1pad = jnp.concatenate([zrow, h1, zrow], axis=0)    # ((SEQ+2)*Bt, FN)
    y2 = b2row_ref[...]                                  # (1, N_CHAN) broadcasts up
    for k in range(KSIZE):
        y2 = y2 + jnp.dot(h1pad[k * Bt:k * Bt + SB, :], w2mat_ref[k],
                          preferred_element_type=jnp.float32)   # (SB, N_CHAN)

    # ---- weighted combine (learn_concat weights) ----
    out_ref[...] = (wcat0_ref[...] * lstm_y + wcat1_ref[...] * y2).astype(out_ref.dtype)


# ---------------- wrapper ----------------
def parallel_cnn_lstm(x, params, b_tile=B_TILE):
    """x: (B, 1, N_CHAN, SEQ) float32, NCHW like PyTorch. Returns same shape."""
    B = x.shape[0]
    H = HIDDEN
    FN = CNN_F * N_CHAN
    n_tiles = pl.cdiv(B, b_tile)
    B_pad = n_tiles * b_tile
    SBt = SEQ * b_tile

    # ---- batch pad to a multiple of the tile, tile/time-major layout ----
    xc = x[:, 0]                                                      # (B, N_CHAN, SEQ)
    if B_pad != B:
        xc = jnp.pad(xc, ((0, B_pad - B), (0, 0), (0, 0)))            # zero pad rows
    # (n_tiles, b_tile, N_CHAN, SEQ) -> (n_tiles, SEQ, b_tile, N_CHAN)
    x4 = jnp.transpose(xc.reshape(n_tiles, b_tile, N_CHAN, SEQ), (0, 3, 1, 2))
    x4p = jnp.pad(x4, ((0, 0), (1, 1), (0, 0), (0, 0)))               # pad time by 1
    # im2col along time: taps [t-1, t, t+1] concatenated on the channel axis.
    im2col = jnp.concatenate([x4p[:, k:k + SEQ] for k in range(KSIZE)], axis=-1)
    im2col = im2col.reshape(n_tiles * SBt, KSIZE * N_CHAN)            # (n_tiles*SBt, 12)

    # ---- gate reorder [i, f, g, o] -> [i, f, o, g] (free one-time permutation) ----
    perm = jnp.concatenate([jnp.arange(0, 2 * H),
                            jnp.arange(3 * H, 4 * H),
                            jnp.arange(2 * H, 3 * H)])
    w_ih_r = params["w_ih"][:, perm]
    w_hh_r = params["w_hh"][:, perm]
    b_g_r = params["b_g"][:, perm]

    # ---- conv taps rewritten as matmuls ----
    eye = jnp.eye(N_CHAN, dtype=jnp.float32)
    w1mat = jnp.einsum("fk,xc->kxfc", params["w1"], eye).reshape(KSIZE, N_CHAN, FN)
    b1row = jnp.repeat(params["b1"], N_CHAN)[None, :]                 # (1, FN)
    w2mat = jnp.einsum("fk,cd->kfcd", params["w2"], eye).reshape(KSIZE, FN, N_CHAN)
    b2row = jnp.full((1, N_CHAN), params["b2"][0], jnp.float32)

    # ---- fused weight: [ W_ih (center tap only) | conv1 taps ] ----
    wcomb = jnp.zeros((KSIZE * N_CHAN, 4 * H + FN), jnp.float32)
    wcomb = wcomb.at[N_CHAN:2 * N_CHAN, :4 * H].set(w_ih_r)           # x_t -> gates
    for k in range(KSIZE):
        wcomb = wcomb.at[k * N_CHAN:(k + 1) * N_CHAN, 4 * H:].set(w1mat[k])
    bcomb = jnp.concatenate([b_g_r, b1row], axis=1)                   # (1, 4H+FN)

    # ---- learn_concat weights: one shared (SBt, N_CHAN) block for all tiles ----
    def cat_tm(w):
        w_t = jnp.transpose(w[0, 0], (1, 0))                          # (SEQ, N_CHAN)
        return jnp.broadcast_to(w_t[:, None, :],
                                (SEQ, b_tile, N_CHAN)).reshape(SBt, N_CHAN)

    wcat0 = cat_tm(params["w_cat0"])
    wcat1 = cat_tm(params["w_cat1"])

    def rep_spec(shape):
        nd = len(shape)
        return pl.BlockSpec(shape, lambda i, _nd=nd: (0,) * _nd)      # same block each tile

    out2d = pl.pallas_call(
        parallel_cnn_lstm_kernel,
        out_shape=jax.ShapeDtypeStruct((n_tiles * SBt, N_CHAN), jnp.float32),
        grid_spec=pltpu.PrefetchScalarGridSpec(
            num_scalar_prefetch=0,
            grid=(n_tiles,),                                          # batch tiles
            in_specs=[
                pl.BlockSpec((SBt, KSIZE * N_CHAN), lambda i: (i, 0)),  # im2col tile
                rep_spec((KSIZE * N_CHAN, 4 * H + FN)),                 # fused weight
                rep_spec((1, 4 * H + FN)),                              # fused bias
                rep_spec((H, 4 * H)),                                   # W_hh (reordered)
                rep_spec((H, N_CHAN)),                                  # W_out
                rep_spec((1, N_CHAN)),                                  # b_out
                rep_spec((KSIZE, FN, N_CHAN)),                          # conv2 tap mats
                rep_spec((1, N_CHAN)),                                  # conv2 bias
                rep_spec((SBt, N_CHAN)),                                # w_cat0 (shared)
                rep_spec((SBt, N_CHAN)),                                # w_cat1 (shared)
            ],
            out_specs=pl.BlockSpec((SBt, N_CHAN), lambda i: (i, 0)),
        ),
        compiler_params=pltpu.CompilerParams(
            dimension_semantics=("parallel",)),                        # both v7x TCs
    )(im2col, wcomb, bcomb, w_hh_r, params["w_out"], params["b_out"],
      w2mat, b2row, wcat0, wcat1)

    # Back to NCHW (B, 1, N_CHAN, SEQ); drop batch-pad rows.
    out = jnp.transpose(out2d.reshape(n_tiles, SEQ, b_tile, N_CHAN), (0, 2, 3, 1))
    out = out.reshape(B_pad, N_CHAN, SEQ)[:B]
    return out[:, None, :, :]


# ---------------- pure-JAX reference (same synthesized submodels) ----------------
def reference(x, params):
    x_t = jnp.transpose(x[:, 0], (0, 2, 1))                    # (B, SEQ, N_CHAN)

    def lstm_one(xb):
        def step(carry, x_row):
            h, c = carry
            gates = (x_row[None, :] @ params["w_ih"] + h @ params["w_hh"] + params["b_g"])
            i = jax.nn.sigmoid(gates[:, :HIDDEN])
            f = jax.nn.sigmoid(gates[:, HIDDEN:2 * HIDDEN])
            g = jnp.tanh(gates[:, 2 * HIDDEN:3 * HIDDEN])
            o = jax.nn.sigmoid(gates[:, 3 * HIDDEN:])
            c = f * c + i * g
            h = o * jnp.tanh(c)
            y = h @ params["w_out"] + params["b_out"]
            return (h, c), y[0]

        init = (jnp.zeros((1, HIDDEN), jnp.float32), jnp.zeros((1, HIDDEN), jnp.float32))
        _, ys = lax.scan(step, init, xb)
        return ys                                              # (SEQ, N_CHAN)

    y1 = jax.vmap(lstm_one)(x_t)                               # (B, SEQ, N_CHAN)
    y1_nchw = jnp.transpose(y1, (0, 2, 1))                     # (B, N_CHAN, SEQ)

    xc = x[:, 0]                                               # (B, N_CHAN, SEQ)
    xpad = jnp.pad(xc, ((0, 0), (0, 0), (1, 1)))
    h1 = []
    for f in range(CNN_F):
        acc = sum(params["w1"][f, k] * xpad[:, :, k:k + SEQ] for k in range(KSIZE))
        h1.append(jnp.maximum(acc + params["b1"][f], 0.0))
    h1pad = [jnp.pad(h, ((0, 0), (0, 0), (1, 1))) for h in h1]
    y2 = params["b2"][0] + sum(
        params["w2"][f, k] * h1pad[f][:, :, k:k + SEQ]
        for f in range(CNN_F) for k in range(KSIZE)
    )

    out = params["w_cat0"][0, 0] * y1_nchw + params["w_cat1"][0, 0] * y2
    return out[:, None, :, :]


def init_params(key):
    ks = jax.random.split(key, 8)
    p = {
        "w_ih": 0.3 * jax.random.normal(ks[0], (N_CHAN, 4 * HIDDEN), jnp.float32),
        "w_hh": 0.3 * jax.random.normal(ks[1], (HIDDEN, 4 * HIDDEN), jnp.float32),
        "b_g":  0.1 * jax.random.normal(ks[2], (1, 4 * HIDDEN), jnp.float32),
        "w_out": 0.3 * jax.random.normal(ks[3], (HIDDEN, N_CHAN), jnp.float32),
        "b_out": 0.1 * jax.random.normal(ks[4], (1, N_CHAN), jnp.float32),
        "w1": 0.5 * jax.random.normal(ks[5], (CNN_F, KSIZE), jnp.float32),
        "b1": 0.1 * jax.random.normal(ks[6], (CNN_F,), jnp.float32),
        "w2": 0.5 * jax.random.normal(ks[7], (CNN_F, KSIZE), jnp.float32),
        "b2": jnp.array([0.05], jnp.float32),
        # learn_concat=True -> nn.Parameter(torch.ones(1, 1, n_chan, seq_length))
        "w_cat0": jnp.ones((1, 1, N_CHAN, SEQ), jnp.float32),
        "w_cat1": jnp.ones((1, 1, N_CHAN, SEQ), jnp.float32),
    }
    return p


if __name__ == "__main__":
    key = jax.random.PRNGKey(0)
    pkey, xkey = jax.random.split(key)
    params = init_params(pkey)

    B = 2
    x = jax.random.normal(xkey, (B, 1, N_CHAN, SEQ), jnp.float32)   # NCHW like PyTorch

    out = parallel_cnn_lstm(x, params)
    out = jax.block_until_ready(out)

    ref = jax.block_until_ready(reference(x, params))
    assert out.shape == (B, 1, N_CHAN, SEQ), out.shape
    assert jnp.allclose(out, ref, atol=5e-4, rtol=5e-4), float(jnp.max(jnp.abs(out - ref)))

    print("KERNEL_OK")
</pallas_src>

<mosaic_0001>
module attributes {stable_mosaic.version = 11 : i64} {
  func.func @parallel_cnn_lstm_kernel(%arg0: i32, %arg1: memref<128x12xf32, #tpu.memory_space<vmem>>, %arg2: memref<12x160xf32, #tpu.memory_space<vmem>>, %arg3: memref<1x160xf32, #tpu.memory_space<vmem>>, %arg4: memref<32x128xf32, #tpu.memory_space<vmem>>, %arg5: memref<32x4xf32, #tpu.memory_space<vmem>>, %arg6: memref<1x4xf32, #tpu.memory_space<vmem>>, %arg7: memref<3x32x4xf32, #tpu.memory_space<vmem>>, %arg8: memref<1x4xf32, #tpu.memory_space<vmem>>, %arg9: memref<128x4xf32, #tpu.memory_space<vmem>>, %arg10: memref<128x4xf32, #tpu.memory_space<vmem>>, %arg11: memref<128x4xf32, #tpu.memory_space<vmem>>) attributes {dimension_semantics = [#tpu.dimension_semantics<parallel>], iteration_bounds = array<i64: 1>, scalar_prefetch = 0 : i64, scratch_operands = 0 : i64, tpu.core_type = #tpu.core_type<tc>, window_params = [{transform_indices = @transform_0, window_bounds = array<i64: 128, 12>}, {pipeline_mode = #tpu.pipeline_mode<synchronous>, transform_indices = @transform_1, window_bounds = array<i64: 12, 160>}, {pipeline_mode = #tpu.pipeline_mode<synchronous>, transform_indices = @transform_2, window_bounds = array<i64: 1, 160>}, {pipeline_mode = #tpu.pipeline_mode<synchronous>, transform_indices = @transform_3, window_bounds = array<i64: 32, 128>}, {pipeline_mode = #tpu.pipeline_mode<synchronous>, transform_indices = @transform_4, window_bounds = array<i64: 32, 4>}, {pipeline_mode = #tpu.pipeline_mode<synchronous>, transform_indices = @transform_5, window_bounds = array<i64: 1, 4>}, {pipeline_mode = #tpu.pipeline_mode<synchronous>, transform_indices = @transform_6, window_bounds = array<i64: 3, 32, 4>}, {pipeline_mode = #tpu.pipeline_mode<synchronous>, transform_indices = @transform_7, window_bounds = array<i64: 1, 4>}, {pipeline_mode = #tpu.pipeline_mode<synchronous>, transform_indices = @transform_8, window_bounds = array<i64: 128, 4>}, {pipeline_mode = #tpu.pipeline_mode<synchronous>, transform_indices = @transform_9, window_bounds = array<i64: 128, 4>}, {transform_indices = @transform_10, window_bounds = array<i64: 128, 4>}]} {
    %c0 = arith.constant 0 : index
    %c0_0 = arith.constant 0 : index
    %0 = vector.load %arg1[%c0, %c0_0] : memref<128x12xf32, #tpu.memory_space<vmem>>, vector<128x12xf32>
    %c0_1 = arith.constant 0 : index
    %c0_2 = arith.constant 0 : index
    %1 = vector.load %arg2[%c0_1, %c0_2] : memref<12x160xf32, #tpu.memory_space<vmem>>, vector<12x160xf32>
    %cst = arith.constant dense<0.000000e+00> : vector<128x160xf32>
    %2 = tpu.matmul %0, %1, %cst {dimension_numbers = #tpu.dot_dimension_numbers<[1], [0], [0], [1], [0, 0, 1, 1], [], []>} : vector<128x12xf32>, vector<12x160xf32>, vector<128x160xf32> -> vector<128x160xf32>
    %c0_3 = arith.constant 0 : index
    %c0_4 = arith.constant 0 : index
    %3 = vector.load %arg3[%c0_3, %c0_4] : memref<1x160xf32, #tpu.memory_space<vmem>>, vector<1x160xf32>
    %4 = vector.broadcast %3 : vector<1x160xf32> to vector<128x160xf32>
    %5 = arith.addf %2, %4 : vector<128x160xf32>
    %6 = vector.extract_strided_slice %5 {offsets = [0, 0], sizes = [128, 128], strides = [1, 1]} : vector<128x160xf32> to vector<128x128xf32>
    %7 = vector.extract_strided_slice %5 {offsets = [0, 128], sizes = [128, 32], strides = [1, 1]} : vector<128x160xf32> to vector<128x32xf32>
    %cst_5 = arith.constant 0.000000e+00 : f32
    %8 = vector.broadcast %cst_5 : f32 to vector<128x32xf32>
    %9 = arith.maximumf %7, %8 : vector<128x32xf32>
    %c0_6 = arith.constant 0 : index
    %c0_7 = arith.constant 0 : index
    %10 = vector.load %arg4[%c0_6, %c0_7] : memref<32x128xf32, #tpu.memory_space<vmem>>, vector<32x128xf32>
    %cst_8 = arith.constant 0.000000e+00 : f32
    %11 = vector.broadcast %cst_8 : f32 to vector<8x32xf32>
    %cst_9 = arith.constant 0.000000e+00 : f32
    %12 = vector.broadcast %cst_9 : f32 to vector<8x32xf32>
    %13 = vector.extract_strided_slice %6 {offsets = [0, 0], sizes = [8, 128], strides = [1, 1]} : vector<128x128xf32> to vector<8x128xf32>
    %cst_10 = arith.constant dense<0.000000e+00> : vector<8x128xf32>
    %14 = tpu.matmul %11, %10, %cst_10 {dimension_numbers = #tpu.dot_dimension_numbers<[1], [0], [0], [1], [0, 0, 1, 1], [], []>} : vector<8x32xf32>, vector<32x128xf32>, vector<8x128xf32> -> vector<8x128xf32>
    %15 = arith.addf %13, %14 : vector<8x128xf32>
    %16 = vector.extract_strided_slice %15 {offsets = [0, 0], sizes = [8, 96], strides = [1, 1]} : vector<8x128xf32> to vector<8x96xf32>
    %17 = arith.negf %16 : vector<8x96xf32>
    %18 = math.exp %17 : vector<8x96xf32>
    %cst_11 = arith.constant 1.000000e+00 : f32
    %19 = vector.broadcast %cst_11 : f32 to vector<8x96xf32>
    %20 = arith.addf %19, %18 : vector<8x96xf32>
    %21 = arith.divf %19, %20 : vector<8x96xf32>
    %22 = vector.extract_strided_slice %15 {offsets = [0, 96], sizes = [8, 32], strides = [1, 1]} : vector<8x128xf32> to vector<8x32xf32>
    %23 = math.tanh %22 : vector<8x32xf32>
    %24 = vector.extract_strided_slice %21 {offsets = [0, 0], sizes = [8, 32], strides = [1, 1]} : vector<8x96xf32> to vector<8x32xf32>
    %25 = vector.extract_strided_slice %21 {offsets = [0, 32], sizes = [8, 32], strides = [1, 1]} : vector<8x96xf32> to vector<8x32xf32>
    %26 = vector.extract_strided_slice %21 {offsets = [0, 64], sizes = [8, 32], strides = [1, 1]} : vector<8x96xf32> to vector<8x32xf32>
    %27 = arith.mulf %25, %12 : vector<8x32xf32>
    %28 = arith.mulf %24, %23 : vector<8x32xf32>
    %29 = arith.addf %27, %28 : vector<8x32xf32>
    %30 = math.tanh %29 : vector<8x32xf32>
    %31 = arith.mulf %26, %30 : vector<8x32xf32>
    %32 = vector.extract_strided_slice %6 {offsets = [8, 0], sizes = [8, 128], strides = [1, 1]} : vector<128x128xf32> to vector<8x128xf32>
    %cst_12 = arith.constant dense<0.000000e+00> : vector<8x128xf32>
    %33 = tpu.matmul %31, %10, %cst_12 {dimension_numbers = #tpu.dot_dimension_numbers<[1], [0], [0], [1], [0, 0, 1, 1], [], []>} : vector<8x32xf32>, vector<32x128xf32>, vector<8x128xf32> -> vector<8x128xf32>
    %34 = arith.addf %32, %33 : vector<8x128xf32>
    %35 = vector.extract_strided_slice %34 {offsets = [0, 0], sizes = [8, 96], strides = [1, 1]} : vector<8x128xf32> to vector<8x96xf32>
    %36 = arith.negf %35 : vector<8x96xf32>
    %37 = math.exp %36 : vector<8x96xf32>
    %cst_13 = arith.constant 1.000000e+00 : f32
    %38 = vector.broadcast %cst_13 : f32 to vector<8x96xf32>
    %39 = arith.addf %38, %37 : vector<8x96xf32>
    %40 = arith.divf %38, %39 : vector<8x96xf32>
    %41 = vector.extract_strided_slice %34 {offsets = [0, 96], sizes = [8, 32], strides = [1, 1]} : vector<8x128xf32> to vector<8x32xf32>
    %42 = math.tanh %41 : vector<8x32xf32>
    %43 = vector.extract_strided_slice %40 {offsets = [0, 0], sizes = [8, 32], strides = [1, 1]} : vector<8x96xf32> to vector<8x32xf32>
    %44 = vector.extract_strided_slice %40 {offsets = [0, 32], sizes = [8, 32], strides = [1, 1]} : vector<8x96xf32> to vector<8x32xf32>
    %45 = vector.extract_strided_slice %40 {offsets = [0, 64], sizes = [8, 32], strides = [1, 1]} : vector<8x96xf32> to vector<8x32xf32>
    %46 = arith.mulf %44, %29 : vector<8x32xf32>
    %47 = arith.mulf %43, %42 : vector<8x32xf32>
    %48 = arith.addf %46, %47 : vector<8x32xf32>
    %49 = math.tanh %48 : vector<8x32xf32>
    %50 = arith.mulf %45, %49 : vector<8x32xf32>
    %51 = vector.extract_strided_slice %6 {offsets = [16, 0], sizes = [8, 128], strides = [1, 1]} : vector<128x128xf32> to vector<8x128xf32>
    %cst_14 = arith.constant dense<0.000000e+00> : vector<8x128xf32>
    %52 = tpu.matmul %50, %10, %cst_14 {dimension_numbers = #tpu.dot_dimension_numbers<[1], [0], [0], [1], [0, 0, 1, 1], [], []>} : vector<8x32xf32>, vector<32x128xf32>, vector<8x128xf32> -> vector<8x128xf32>
    %53 = arith.addf %51, %52 : vector<8x128xf32>
    %54 = vector.extract_strided_slice %53 {offsets = [0, 0], sizes = [8, 96], strides = [1, 1]} : vector<8x128xf32> to vector<8x96xf32>
    %55 = arith.negf %54 : vector<8x96xf32>
    %56 = math.exp %55 : vector<8x96xf32>
    %cst_15 = arith.constant 1.000000e+00 : f32
    %57 = vector.broadcast %cst_15 : f32 to vector<8x96xf32>
    %58 = arith.addf %57, %56 : vector<8x96xf32>
    %59 = arith.divf %57, %58 : vector<8x96xf32>
    %60 = vector.extract_strided_slice %53 {offsets = [0, 96], sizes = [8, 32], strides = [1, 1]} : vector<8x128xf32> to vector<8x32xf32>
    %61 = math.tanh %60 : vector<8x32xf32>
    %62 = vector.extract_strided_slice %59 {offsets = [0, 0], sizes = [8, 32], strides = [1, 1]} : vector<8x96xf32> to vector<8x32xf32>
    %63 = vector.extract_strided_slice %59 {offsets = [0, 32], sizes = [8, 32], strides = [1, 1]} : vector<8x96xf32> to vector<8x32xf32>
    %64 = vector.extract_strided_slice %59 {offsets = [0, 64], sizes = [8, 32], strides = [1, 1]} : vector<8x96xf32> to vector<8x32xf32>
    %65 = arith.mulf %63, %48 : vector<8x32xf32>
    %66 = arith.mulf %62, %61 : vector<8x32xf32>
    %67 = arith.addf %65, %66 : vector<8x32xf32>
    %68 = math.tanh %67 : vector<8x32xf32>
    %69 = arith.mulf %64, %68 : vector<8x32xf32>
    %70 = vector.extract_strided_slice %6 {offsets = [24, 0], sizes = [8, 128], strides = [1, 1]} : vector<128x128xf32> to vector<8x128xf32>
    %cst_16 = arith.constant dense<0.000000e+00> : vector<8x128xf32>
    %71 = tpu.matmul %69, %10, %cst_16 {dimension_numbers = #tpu.dot_dimension_numbers<[1], [0], [0], [1], [0, 0, 1, 1], [], []>} : vector<8x32xf32>, vector<32x128xf32>, vector<8x128xf32> -> vector<8x128xf32>
    %72 = arith.addf %70, %71 : vector<8x128xf32>
    %73 = vector.extract_strided_slice %72 {offsets = [0, 0], sizes = [8, 96], strides = [1, 1]} : vector<8x128xf32> to vector<8x96xf32>
    %74 = arith.negf %73 : vector<8x96xf32>
    %75 = math.exp %74 : vector<8x96xf32>
    %cst_17 = arith.constant 1.000000e+00 : f32
    %76 = vector.broadcast %cst_17 : f32 to vector<8x96xf32>
    %77 = arith.addf %76, %75 : vector<8x96xf32>
    %78 = arith.divf %76, %77 : vector<8x96xf32>
    %79 = vector.extract_strided_slice %72 {offsets = [0, 96], sizes = [8, 32], strides = [1, 1]} : vector<8x128xf32> to vector<8x32xf32>
    %80 = math.tanh %79 : vector<8x32xf32>
    %81 = vector.extract_strided_slice %78 {offsets = [0, 0], sizes = [8, 32], strides = [1, 1]} : vector<8x96xf32> to vector<8x32xf32>
    %82 = vector.extract_strided_slice %78 {offsets = [0, 32], sizes = [8, 32], strides = [1, 1]} : vector<8x96xf32> to vector<8x32xf32>
    %83 = vector.extract_strided_slice %78 {offsets = [0, 64], sizes = [8, 32], strides = [1, 1]} : vector<8x96xf32> to vector<8x32xf32>
    %84 = arith.mulf %82, %67 : vector<8x32xf32>
    %85 = arith.mulf %81, %80 : vector<8x32xf32>
    %86 = arith.addf %84, %85 : vector<8x32xf32>
    %87 = math.tanh %86 : vector<8x32xf32>
    %88 = arith.mulf %83, %87 : vector<8x32xf32>
    %89 = vector.extract_strided_slice %6 {offsets = [32, 0], sizes = [8, 128], strides = [1, 1]} : vector<128x128xf32> to vector<8x128xf32>
    %cst_18 = arith.constant dense<0.000000e+00> : vector<8x128xf32>
    %90 = tpu.matmul %88, %10, %cst_18 {dimension_numbers = #tpu.dot_dimension_numbers<[1], [0], [0], [1], [0, 0, 1, 1], [], []>} : vector<8x32xf32>, vector<32x128xf32>, vector<8x128xf32> -> vector<8x128xf32>
    %91 = arith.addf %89, %90 : vector<8x128xf32>
    %92 = vector.extract_strided_slice %91 {offsets = [0, 0], sizes = [8, 96], strides = [1, 1]} : vector<8x128xf32> to vector<8x96xf32>
    %93 = arith.negf %92 : vector<8x96xf32>
    %94 = math.exp %93 : vector<8x96xf32>
    %cst_19 = arith.constant 1.000000e+00 : f32
    %95 = vector.broadcast %cst_19 : f32 to vector<8x96xf32>
    %96 = arith.addf %95, %94 : vector<8x96xf32>
    %97 = arith.divf %95, %96 : vector<8x96xf32>
    %98 = vector.extract_strided_slice %91 {offsets = [0, 96], sizes = [8, 32], strides = [1, 1]} : vector<8x128xf32> to vector<8x32xf32>
    %99 = math.tanh %98 : vector<8x32xf32>
    %100 = vector.extract_strided_slice %97 {offsets = [0, 0], sizes = [8, 32], strides = [1, 1]} : vector<8x96xf32> to vector<8x32xf32>
    %101 = vector.extract_strided_slice %97 {offsets = [0, 32], sizes = [8, 32], strides = [1, 1]} : vector<8x96xf32> to vector<8x32xf32>
    %102 = vector.extract_strided_slice %97 {offsets = [0, 64], sizes = [8, 32], strides = [1, 1]} : vector<8x96xf32> to vector<8x32xf32>
    %103 = arith.mulf %101, %86 : vector<8x32xf32>
    %104 = arith.mulf %100, %99 : vector<8x32xf32>
    %105 = arith.addf %103, %104 : vector<8x32xf32>
    %106 = math.tanh %105 : vector<8x32xf32>
    %107 = arith.mulf %102, %106 : vector<8x32xf32>
    %108 = vector.extract_strided_slice %6 {offsets = [40, 0], sizes = [8, 128], strides = [1, 1]} : vector<128x128xf32> to vector<8x128xf32>
    %cst_20 = arith.constant dense<0.000000e+00> : vector<8x128xf32>
    %109 = tpu.matmul %107, %10, %cst_20 {dimension_numbers = #tpu.dot_dimension_numbers<[1], [0], [0], [1], [0, 0, 1, 1], [], []>} : vector<8x32xf32>, vector<32x128xf32>, vector<8x128xf32> -> vector<8x128xf32>
    %110 = arith.addf %108, %109 : vector<8x128xf32>
    %111 = vector.extract_strided_slice %110 {offsets = [0, 0], sizes = [8, 96], strides = [1, 1]} : vector<8x128xf32> to vector<8x96xf32>
    %112 = arith.negf %111 : vector<8x96xf32>
    %113 = math.exp %112 : vector<8x96xf32>
    %cst_21 = arith.constant 1.000000e+00 : f32
    %114 = vector.broadcast %cst_21 : f32 to vector<8x96xf32>
    %115 = arith.addf %114, %113 : vector<8x96xf32>
    %116 = arith.divf %114, %115 : vector<8x96xf32>
    %117 = vector.extract_strided_slice %110 {offsets = [0, 96], sizes = [8, 32], strides = [1, 1]} : vector<8x128xf32> to vector<8x32xf32>
    %118 = math.tanh %117 : vector<8x32xf32>
    %119 = vector.extract_strided_slice %116 {offsets = [0, 0], sizes = [8, 32], strides = [1, 1]} : vector<8x96xf32> to vector<8x32xf32>
    %120 = vector.extract_strided_slice %116 {offsets = [0, 32], sizes = [8, 32], strides = [1, 1]} : vector<8x96xf32> to vector<8x32xf32>
    %121 = vector.extract_strided_slice %116 {offsets = [0, 64], sizes = [8, 32], strides = [1, 1]} : vector<8x96xf32> to vector<8x32xf32>
    %122 = arith.mulf %120, %105 : vector<8x32xf32>
    %123 = arith.mulf %119, %118 : vector<8x32xf32>
    %124 = arith.addf %122, %123 : vector<8x32xf32>
    %125 = math.tanh %124 : vector<8x32xf32>
    %126 = arith.mulf %121, %125 : vector<8x32xf32>
    %127 = vector.extract_strided_slice %6 {offsets = [48, 0], sizes = [8, 128], strides = [1, 1]} : vector<128x128xf32> to vector<8x128xf32>
    %cst_22 = arith.constant dense<0.000000e+00> : vector<8x128xf32>
    %128 = tpu.matmul %126, %10, %cst_22 {dimension_numbers = #tpu.dot_dimension_numbers<[1], [0], [0], [1], [0, 0, 1, 1], [], []>} : vector<8x32xf32>, vector<32x128xf32>, vector<8x128xf32> -> vector<8x128xf32>
    %129 = arith.addf %127, %128 : vector<8x128xf32>
    %130 = vector.extract_strided_slice %129 {offsets = [0, 0], sizes = [8, 96], strides = [1, 1]} : vector<8x128xf32> to vector<8x96xf32>
    %131 = arith.negf %130 : vector<8x96xf32>
    %132 = math.exp %131 : vector<8x96xf32>
    %cst_23 = arith.constant 1.000000e+00 : f32
    %133 = vector.broadcast %cst_23 : f32 to vector<8x96xf32>
    %134 = arith.addf %133, %132 : vector<8x96xf32>
    %135 = arith.divf %133, %134 : vector<8x96xf32>
    %136 = vector.extract_strided_slice %129 {offsets = [0, 96], sizes = [8, 32], strides = [1, 1]} : vector<8x128xf32> to vector<8x32xf32>
    %137 = math.tanh %136 : vector<8x32xf32>
    %138 = vector.extract_strided_slice %135 {offsets = [0, 0], sizes = [8, 32], strides = [1, 1]} : vector<8x96xf32> to vector<8x32xf32>
    %139 = vector.extract_strided_slice %135 {offsets = [0, 32], sizes = [8, 32], strides = [1, 1]} : vector<8x96xf32> to vector<8x32xf32>
    %140 = vector.extract_strided_slice %135 {offsets = [0, 64], sizes = [8, 32], strides = [1, 1]} : vector<8x96xf32> to vector<8x32xf32>
    %141 = arith.mulf %139, %124 : vector<8x32xf32>
    %142 = arith.mulf %138, %137 : vector<8x32xf32>
    %143 = arith.addf %141, %142 : vector<8x32xf32>
    %144 = math.tanh %143 : vector<8x32xf32>
    %145 = arith.mulf %140, %144 : vector<8x32xf32>
    %146 = vector.extract_strided_slice %6 {offsets = [56, 0], sizes = [8, 128], strides = [1, 1]} : vector<128x128xf32> to vector<8x128xf32>
    %cst_24 = arith.constant dense<0.000000e+00> : vector<8x128xf32>
    %147 = tpu.matmul %145, %10, %cst_24 {dimension_numbers = #tpu.dot_dimension_numbers<[1], [0], [0], [1], [0, 0, 1, 1], [], []>} : vector<8x32xf32>, vector<32x128xf32>, vector<8x128xf32> -> vector<8x128xf32>
    %148 = arith.addf %146, %147 : vector<8x128xf32>
    %149 = vector.extract_strided_slice %148 {offsets = [0, 0], sizes = [8, 96], strides = [1, 1]} : vector<8x128xf32> to vector<8x96xf32>
    %150 = arith.negf %149 : vector<8x96xf32>
    %151 = math.exp %150 : vector<8x96xf32>
    %cst_25 = arith.constant 1.000000e+00 : f32
    %152 = vector.broadcast %cst_25 : f32 to vector<8x96xf32>
    %153 = arith.addf %152, %151 : vector<8x96xf32>
    %154 = arith.divf %152, %153 : vector<8x96xf32>
    %155 = vector.extract_strided_slice %148 {offsets = [0, 96], sizes = [8, 32], strides = [1, 1]} : vector<8x128xf32> to vector<8x32xf32>
    %156 = math.tanh %155 : vector<8x32xf32>
    %157 = vector.extract_strided_slice %154 {offsets = [0, 0], sizes = [8, 32], strides = [1, 1]} : vector<8x96xf32> to vector<8x32xf32>
    %158 = vector.extract_strided_slice %154 {offsets = [0, 32], sizes = [8, 32], strides = [1, 1]} : vector<8x96xf32> to vector<8x32xf32>
    %159 = vector.extract_strided_slice %154 {offsets = [0, 64], sizes = [8, 32], strides = [1, 1]} : vector<8x96xf32> to vector<8x32xf32>
    %160 = arith.mulf %158, %143 : vector<8x32xf32>
    %161 = arith.mulf %157, %156 : vector<8x32xf32>
    %162 = arith.addf %160, %161 : vector<8x32xf32>
    %163 = math.tanh %162 : vector<8x32xf32>
    %164 = arith.mulf %159, %163 : vector<8x32xf32>
    %165 = vector.extract_strided_slice %6 {offsets = [64, 0], sizes = [8, 128], strides = [1, 1]} : vector<128x128xf32> to vector<8x128xf32>
    %cst_26 = arith.constant dense<0.000000e+00> : vector<8x128xf32>
    %166 = tpu.matmul %164, %10, %cst_26 {dimension_numbers = #tpu.dot_dimension_numbers<[1], [0], [0], [1], [0, 0, 1, 1], [], []>} : vector<8x32xf32>, vector<32x128xf32>, vector<8x128xf32> -> vector<8x128xf32>
    %167 = arith.addf %165, %166 : vector<8x128xf32>
    %168 = vector.extract_strided_slice %167 {offsets = [0, 0], sizes = [8, 96], strides = [1, 1]} : vector<8x128xf32> to vector<8x96xf32>
    %169 = arith.negf %168 : vector<8x96xf32>
    %170 = math.exp %169 : vector<8x96xf32>
    %cst_27 = arith.constant 1.000000e+00 : f32
    %171 = vector.broadcast %cst_27 : f32 to vector<8x96xf32>
    %172 = arith.addf %171, %170 : vector<8x96xf32>
    %173 = arith.divf %171, %172 : vector<8x96xf32>
    %174 = vector.extract_strided_slice %167 {offsets = [0, 96], sizes = [8, 32], strides = [1, 1]} : vector<8x128xf32> to vector<8x32xf32>
    %175 = math.tanh %174 : vector<8x32xf32>
    %176 = vector.extract_strided_slice %173 {offsets = [0, 0], sizes = [8, 32], strides = [1, 1]} : vector<8x96xf32> to vector<8x32xf32>
    %177 = vector.extract_strided_slice %173 {offsets = [0, 32], sizes = [8, 32], strides = [1, 1]} : vector<8x96xf32> to vector<8x32xf32>
    %178 = vector.extract_strided_slice %173 {offsets = [0, 64], sizes = [8, 32], strides = [1, 1]} : vector<8x96xf32> to vector<8x32xf32>
    %179 = arith.mulf %177, %162 : vector<8x32xf32>
    %180 = arith.mulf %176, %175 : vector<8x32xf32>
    %181 = arith.addf %179, %180 : vector<8x32xf32>
    %182 = math.tanh %181 : vector<8x32xf32>
    %183 = arith.mulf %178, %182 : vector<8x32xf32>
    %184 = vector.extract_strided_slice %6 {offsets = [72, 0], sizes = [8, 128], strides = [1, 1]} : vector<128x128xf32> to vector<8x128xf32>
    %cst_28 = arith.constant dense<0.000000e+00> : vector<8x128xf32>
    %185 = tpu.matmul %183, %10, %cst_28 {dimension_numbers = #tpu.dot_dimension_numbers<[1], [0], [0], [1], [0, 0, 1, 1], [], []>} : vector<8x32xf32>, vector<32x128xf32>, vector<8x128xf32> -> vector<8x128xf32>
    %186 = arith.addf %184, %185 : vector<8x128xf32>
    %187 = vector.extract_strided_slice %186 {offsets = [0, 0], sizes = [8, 96], strides = [1, 1]} : vector<8x128xf32> to vector<8x96xf32>
    %188 = arith.negf %187 : vector<8x96xf32>
    %189 = math.exp %188 : vector<8x96xf32>
    %cst_29 = arith.constant 1.000000e+00 : f32
    %190 = vector.broadcast %cst_29 : f32 to vector<8x96xf32>
    %191 = arith.addf %190, %189 : vector<8x96xf32>
    %192 = arith.divf %190, %191 : vector<8x96xf32>
    %193 = vector.extract_strided_slice %186 {offsets = [0, 96], sizes = [8, 32], strides = [1, 1]} : vector<8x128xf32> to vector<8x32xf32>
    %194 = math.tanh %193 : vector<8x32xf32>
    %195 = vector.extract_strided_slice %192 {offsets = [0, 0], sizes = [8, 32], strides = [1, 1]} : vector<8x96xf32> to vector<8x32xf32>
    %196 = vector.extract_strided_slice %192 {offsets = [0, 32], sizes = [8, 32], strides = [1, 1]} : vector<8x96xf32> to vector<8x32xf32>
    %197 = vector.extract_strided_slice %192 {offsets = [0, 64], sizes = [8, 32], strides = [1, 1]} : vector<8x96xf32> to vector<8x32xf32>
    %198 = arith.mulf %196, %181 : vector<8x32xf32>
    %199 = arith.mulf %195, %194 : vector<8x32xf32>
    %200 = arith.addf %198, %199 : vector<8x32xf32>
    %201 = math.tanh %200 : vector<8x32xf32>
    %202 = arith.mulf %197, %201 : vector<8x32xf32>
    %203 = vector.extract_strided_slice %6 {offsets = [80, 0], sizes = [8, 128], strides = [1, 1]} : vector<128x128xf32> to vector<8x128xf32>
    %cst_30 = arith.constant dense<0.000000e+00> : vector<8x128xf32>
    %204 = tpu.matmul %202, %10, %cst_30 {dimension_numbers = #tpu.dot_dimension_numbers<[1], [0], [0], [1], [0, 0, 1, 1], [], []>} : vector<8x32xf32>, vector<32x128xf32>, vector<8x128xf32> -> vector<8x128xf32>
    %205 = arith.addf %203, %204 : vector<8x128xf32>
    %206 = vector.extract_strided_slice %205 {offsets = [0, 0], sizes = [8, 96], strides = [1, 1]} : vector<8x128xf32> to vector<8x96xf32>
    %207 = arith.negf %206 : vector<8x96xf32>
    %208 = math.exp %207 : vector<8x96xf32>
    %cst_31 = arith.constant 1.000000e+00 : f32
    %209 = vector.broadcast %cst_31 : f32 to vector<8x96xf32>
    %210 = arith.addf %209, %208 : vector<8x96xf32>
    %211 = arith.divf %209, %210 : vector<8x96xf32>
    %212 = vector.extract_strided_slice %205 {offsets = [0, 96], sizes = [8, 32], strides = [1, 1]} : vector<8x128xf32> to vector<8x32xf32>
    %213 = math.tanh %212 : vector<8x32xf32>
    %214 = vector.extract_strided_slice %211 {offsets = [0, 0], sizes = [8, 32], strides = [1, 1]} : vector<8x96xf32> to vector<8x32xf32>
    %215 = vector.extract_strided_slice %211 {offsets = [0, 32], sizes = [8, 32], strides = [1, 1]} : vector<8x96xf32> to vector<8x32xf32>
    %216 = vector.extract_strided_slice %211 {offsets = [0, 64], sizes = [8, 32], strides = [1, 1]} : vector<8x96xf32> to vector<8x32xf32>
    %217 = arith.mulf %215, %200 : vector<8x32xf32>
    %218 = arith.mulf %214, %213 : vector<8x32xf32>
    %219 = arith.addf %217, %218 : vector<8x32xf32>
    %220 = math.tanh %219 : vector<8x32xf32>
    %221 = arith.mulf %216, %220 : vector<8x32xf32>
    %222 = vector.extract_strided_slice %6 {offsets = [88, 0], sizes = [8, 128], strides = [1, 1]} : vector<128x128xf32> to vector<8x128xf32>
    %cst_32 = arith.constant dense<0.000000e+00> : vector<8x128xf32>
    %223 = tpu.matmul %221, %10, %cst_32 {dimension_numbers = #tpu.dot_dimension_numbers<[1], [0], [0], [1], [0, 0, 1, 1], [], []>} : vector<8x32xf32>, vector<32x128xf32>, vector<8x128xf32> -> vector<8x128xf32>
    %224 = arith.addf %222, %223 : vector<8x128xf32>
    %225 = vector.extract_strided_slice %224 {offsets = [0, 0], sizes = [8, 96], strides = [1, 1]} : vector<8x128xf32> to vector<8x96xf32>
    %226 = arith.negf %225 : vector<8x96xf32>
    %227 = math.exp %226 : vector<8x96xf32>
    %cst_33 = arith.constant 1.000000e+00 : f32
    %228 = vector.broadcast %cst_33 : f32 to vector<8x96xf32>
    %229 = arith.addf %228, %227 : vector<8x96xf32>
    %230 = arith.divf %228, %229 : vector<8x96xf32>
    %231 = vector.extract_strided_slice %224 {offsets = [0, 96], sizes = [8, 32], strides = [1, 1]} : vector<8x128xf32> to vector<8x32xf32>
    %232 = math.tanh %231 : vector<8x32xf32>
    %233 = vector.extract_strided_slice %230 {offsets = [0, 0], sizes = [8, 32], strides = [1, 1]} : vector<8x96xf32> to vector<8x32xf32>
    %234 = vector.extract_strided_slice %230 {offsets = [0, 32], sizes = [8, 32], strides = [1, 1]} : vector<8x96xf32> to vector<8x32xf32>
    %235 = vector.extract_strided_slice %230 {offsets = [0, 64], sizes = [8, 32], strides = [1, 1]} : vector<8x96xf32> to vector<8x32xf32>
    %236 = arith.mulf %234, %219 : vector<8x32xf32>
    %237 = arith.mulf %233, %232 : vector<8x32xf32>
    %238 = arith.addf %236, %237 : vector<8x32xf32>
    %239 = math.tanh %238 : vector<8x32xf32>
    %240 = arith.mulf %235, %239 : vector<8x32xf32>
    %241 = vector.extract_strided_slice %6 {offsets = [96, 0], sizes = [8, 128], strides = [1, 1]} : vector<128x128xf32> to vector<8x128xf32>
    %cst_34 = arith.constant dense<0.000000e+00> : vector<8x128xf32>
    %242 = tpu.matmul %240, %10, %cst_34 {dimension_numbers = #tpu.dot_dimension_numbers<[1], [0], [0], [1], [0, 0, 1, 1], [], []>} : vector<8x32xf32>, vector<32x128xf32>, vector<8x128xf32> -> vector<8x128xf32>
    %243 = arith.addf %241, %242 : vector<8x128xf32>
    %244 = vector.extract_strided_slice %243 {offsets = [0, 0], sizes = [8, 96], strides = [1, 1]} : vector<8x128xf32> to vector<8x96xf32>
    %245 = arith.negf %244 : vector<8x96xf32>
    %246 = math.exp %245 : vector<8x96xf32>
    %cst_35 = arith.constant 1.000000e+00 : f32
    %247 = vector.broadcast %cst_35 : f32 to vector<8x96xf32>
    %248 = arith.addf %247, %246 : vector<8x96xf32>
    %249 = arith.divf %247, %248 : vector<8x96xf32>
    %250 = vector.extract_strided_slice %243 {offsets = [0, 96], sizes = [8, 32], strides = [1, 1]} : vector<8x128xf32> to vector<8x32xf32>
    %251 = math.tanh %250 : vector<8x32xf32>
    %252 = vector.extract_strided_slice %249 {offsets = [0, 0], sizes = [8, 32], strides = [1, 1]} : vector<8x96xf32> to vector<8x32xf32>
    %253 = vector.extract_strided_slice %249 {offsets = [0, 32], sizes = [8, 32], strides = [1, 1]} : vector<8x96xf32> to vector<8x32xf32>
    %254 = vector.extract_strided_slice %249 {offsets = [0, 64], sizes = [8, 32], strides = [1, 1]} : vector<8x96xf32> to vector<8x32xf32>
    %255 = arith.mulf %253, %238 : vector<8x32xf32>
    %256 = arith.mulf %252, %251 : vector<8x32xf32>
    %257 = arith.addf %255, %256 : vector<8x32xf32>
    %258 = math.tanh %257 : vector<8x32xf32>
    %259 = arith.mulf %254, %258 : vector<8x32xf32>
    %260 = vector.extract_strided_slice %6 {offsets = [104, 0], sizes = [8, 128], strides = [1, 1]} : vector<128x128xf32> to vector<8x128xf32>
    %cst_36 = arith.constant dense<0.000000e+00> : vector<8x128xf32>
    %261 = tpu.matmul %259, %10, %cst_36 {dimension_numbers = #tpu.dot_dimension_numbers<[1], [0], [0], [1], [0, 0, 1, 1], [], []>} : vector<8x32xf32>, vector<32x128xf32>, vector<8x128xf32> -> vector<8x128xf32>
    %262 = arith.addf %260, %261 : vector<8x128xf32>
    %263 = vector.extract_strided_slice %262 {offsets = [0, 0], sizes = [8, 96], strides = [1, 1]} : vector<8x128xf32> to vector<8x96xf32>
    %264 = arith.negf %263 : vector<8x96xf32>
    %265 = math.exp %264 : vector<8x96xf32>
    %cst_37 = arith.constant 1.000000e+00 : f32
    %266 = vector.broadcast %cst_37 : f32 to vector<8x96xf32>
    %267 = arith.addf %266, %265 : vector<8x96xf32>
    %268 = arith.divf %266, %267 : vector<8x96xf32>
    %269 = vector.extract_strided_slice %262 {offsets = [0, 96], sizes = [8, 32], strides = [1, 1]} : vector<8x128xf32> to vector<8x32xf32>
    %270 = math.tanh %269 : vector<8x32xf32>
    %271 = vector.extract_strided_slice %268 {offsets = [0, 0], sizes = [8, 32], strides = [1, 1]} : vector<8x96xf32> to vector<8x32xf32>
    %272 = vector.extract_strided_slice %268 {offsets = [0, 32], sizes = [8, 32], strides = [1, 1]} : vector<8x96xf32> to vector<8x32xf32>
    %273 = vector.extract_strided_slice %268 {offsets = [0, 64], sizes = [8, 32], strides = [1, 1]} : vector<8x96xf32> to vector<8x32xf32>
    %274 = arith.mulf %272, %257 : vector<8x32xf32>
    %275 = arith.mulf %271, %270 : vector<8x32xf32>
    %276 = arith.addf %274, %275 : vector<8x32xf32>
    %277 = math.tanh %276 : vector<8x32xf32>
    %278 = arith.mulf %273, %277 : vector<8x32xf32>
    %279 = vector.extract_strided_slice %6 {offsets = [112, 0], sizes = [8, 128], strides = [1, 1]} : vector<128x128xf32> to vector<8x128xf32>
    %cst_38 = arith.constant dense<0.000000e+00> : vector<8x128xf32>
    %280 = tpu.matmul %278, %10, %cst_38 {dimension_numbers = #tpu.dot_dimension_numbers<[1], [0], [0], [1], [0, 0, 1, 1], [], []>} : vector<8x32xf32>, vector<32x128xf32>, vector<8x128xf32> -> vector<8x128xf32>
    %281 = arith.addf %279, %280 : vector<8x128xf32>
    %282 = vector.extract_strided_slice %281 {offsets = [0, 0], sizes = [8, 96], strides = [1, 1]} : vector<8x128xf32> to vector<8x96xf32>
    %283 = arith.negf %282 : vector<8x96xf32>
    %284 = math.exp %283 : vector<8x96xf32>
    %cst_39 = arith.constant 1.000000e+00 : f32
    %285 = vector.broadcast %cst_39 : f32 to vector<8x96xf32>
    %286 = arith.addf %285, %284 : vector<8x96xf32>
    %287 = arith.divf %285, %286 : vector<8x96xf32>
    %288 = vector.extract_strided_slice %281 {offsets = [0, 96], sizes = [8, 32], strides = [1, 1]} : vector<8x128xf32> to vector<8x32xf32>
    %289 = math.tanh %288 : vector<8x32xf32>
    %290 = vector.extract_strided_slice %287 {offsets = [0, 0], sizes = [8, 32], strides = [1, 1]} : vector<8x96xf32> to vector<8x32xf32>
    %291 = vector.extract_strided_slice %287 {offsets = [0, 32], sizes = [8, 32], strides = [1, 1]} : vector<8x96xf32> to vector<8x32xf32>
    %292 = vector.extract_strided_slice %287 {offsets = [0, 64], sizes = [8, 32], strides = [1, 1]} : vector<8x96xf32> to vector<8x32xf32>
    %293 = arith.mulf %291, %276 : vector<8x32xf32>
    %294 = arith.mulf %290, %289 : vector<8x32xf32>
    %295 = arith.addf %293, %294 : vector<8x32xf32>
    %296 = math.tanh %295 : vector<8x32xf32>
    %297 = arith.mulf %292, %296 : vector<8x32xf32>
    %298 = vector.extract_strided_slice %6 {offsets = [120, 0], sizes = [8, 128], strides = [1, 1]} : vector<128x128xf32> to vector<8x128xf32>
    %cst_40 = arith.constant dense<0.000000e+00> : vector<8x128xf32>
    %299 = tpu.matmul %297, %10, %cst_40 {dimension_numbers = #tpu.dot_dimension_numbers<[1], [0], [0], [1], [0, 0, 1, 1], [], []>} : vector<8x32xf32>, vector<32x128xf32>, vector<8x128xf32> -> vector<8x128xf32>
    %300 = arith.addf %298, %299 : vector<8x128xf32>
    %301 = vector.extract_strided_slice %300 {offsets = [0, 0], sizes = [8, 96], strides = [1, 1]} : vector<8x128xf32> to vector<8x96xf32>
    %302 = arith.negf %301 : vector<8x96xf32>
    %303 = math.exp %302 : vector<8x96xf32>
    %cst_41 = arith.constant 1.000000e+00 : f32
    %304 = vector.broadcast %cst_41 : f32 to vector<8x96xf32>
    %305 = arith.addf %304, %303 : vector<8x96xf32>
    %306 = arith.divf %304, %305 : vector<8x96xf32>
    %307 = vector.extract_strided_slice %300 {offsets = [0, 96], sizes = [8, 32], strides = [1, 1]} : vector<8x128xf32> to vector<8x32xf32>
    %308 = math.tanh %307 : vector<8x32xf32>
    %309 = vector.extract_strided_slice %306 {offsets = [0, 0], sizes = [8, 32], strides = [1, 1]} : vector<8x96xf32> to vector<8x32xf32>
    %310 = vector.extract_strided_slice %306 {offsets = [0, 32], sizes = [8, 32], strides = [1, 1]} : vector<8x96xf32> to vector<8x32xf32>
    %311 = vector.extract_strided_slice %306 {offsets = [0, 64], sizes = [8, 32], strides = [1, 1]} : vector<8x96xf32> to vector<8x32xf32>
    %312 = arith.mulf %310, %295 : vector<8x32xf32>
    %313 = arith.mulf %309, %308 : vector<8x32xf32>
    %314 = arith.addf %312, %313 : vector<8x32xf32>
    %315 = math.tanh %314 : vector<8x32xf32>
    %316 = arith.mulf %311, %315 : vector<8x32xf32>
    %317 = tpu.concatenate %31, %50, %69, %88, %107, %126, %145, %164, %183, %202, %221, %240, %259, %278, %297, %316 in 0 : vector<8x32xf32>, vector<8x32xf32>, vector<8x32xf32>, vector<8x32xf32>, vector<8x32xf32>, vector<8x32xf32>, vector<8x32xf32>, vector<8x32xf32>, vector<8x32xf32>, vector<8x32xf32>, vector<8x32xf32>, vector<8x32xf32>, vector<8x32xf32>, vector<8x32xf32>, vector<8x32xf32>, vector<8x32xf32> -> vector<128x32xf32>
    %c0_42 = arith.constant 0 : index
    %c0_43 = arith.constant 0 : index
    %318 = vector.load %arg5[%c0_42, %c0_43] : memref<32x4xf32, #tpu.memory_space<vmem>>, vector<32x4xf32>
    %cst_44 = arith.constant dense<0.000000e+00> : vector<128x4xf32>
    %319 = tpu.matmul %317, %318, %cst_44 {dimension_numbers = #tpu.dot_dimension_numbers<[1], [0], [0], [1], [0, 0, 1, 1], [], []>} : vector<128x32xf32>, vector<32x4xf32>, vector<128x4xf32> -> vector<128x4xf32>
    %c0_45 = arith.constant 0 : index
    %c0_46 = arith.constant 0 : index
    %320 = vector.load %arg6[%c0_45, %c0_46] : memref<1x4xf32, #tpu.memory_space<vmem>>, vector<1x4xf32>
    %321 = vector.broadcast %320 : vector<1x4xf32> to vector<128x4xf32>
    %322 = arith.addf %319, %321 : vector<128x4xf32>
    %cst_47 = arith.constant 0.000000e+00 : f32
    %323 = vector.broadcast %cst_47 : f32 to vector<8x32xf32>
    %324 = tpu.concatenate %323, %9, %323 in 0 : vector<8x32xf32>, vector<128x32xf32>, vector<8x32xf32> -> vector<144x32xf32>
    %c0_48 = arith.constant 0 : index
    %c0_49 = arith.constant 0 : index
    %325 = vector.load %arg8[%c0_48, %c0_49] : memref<1x4xf32, #tpu.memory_space<vmem>>, vector<1x4xf32>
    %326 = vector.extract_strided_slice %324 {offsets = [0, 0], sizes = [128, 32], strides = [1, 1]} : vector<144x32xf32> to vector<128x32xf32>
    %c0_50 = arith.constant 0 : index
    %c0_51 = arith.constant 0 : index
    %c0_52 = arith.constant 0 : index
    %327 = vector.load %arg7[%c0_50, %c0_51, %c0_52] : memref<3x32x4xf32, #tpu.memory_space<vmem>>, vector<1x32x4xf32>
    %328 = vector.shape_cast %327 : vector<1x32x4xf32> to vector<32x4xf32>
    %cst_53 = arith.constant dense<0.000000e+00> : vector<128x4xf32>
    %329 = tpu.matmul %326, %328, %cst_53 {dimension_numbers = #tpu.dot_dimension_numbers<[1], [0], [0], [1], [0, 0, 1, 1], [], []>} : vector<128x32xf32>, vector<32x4xf32>, vector<128x4xf32> -> vector<128x4xf32>
    %330 = vector.broadcast %325 : vector<1x4xf32> to vector<128x4xf32>
    %331 = arith.addf %330, %329 : vector<128x4xf32>
    %332 = vector.extract_strided_slice %324 {offsets = [8, 0], sizes = [128, 32], strides = [1, 1]} : vector<144x32xf32> to vector<128x32xf32>
    %c1 = arith.constant 1 : index
    %c0_54 = arith.constant 0 : index
    %c0_55 = arith.constant 0 : index
    %333 = vector.load %arg7[%c1, %c0_54, %c0_55] : memref<3x32x4xf32, #tpu.memory_space<vmem>>, vector<1x32x4xf32>
    %334 = vector.shape_cast %333 : vector<1x32x4xf32> to vector<32x4xf32>
    %cst_56 = arith.constant dense<0.000000e+00> : vector<128x4xf32>
    %335 = tpu.matmul %332, %334, %cst_56 {dimension_numbers = #tpu.dot_dimension_numbers<[1], [0], [0], [1], [0, 0, 1, 1], [], []>} : vector<128x32xf32>, vector<32x4xf32>, vector<128x4xf32> -> vector<128x4xf32>
    %336 = arith.addf %331, %335 : vector<128x4xf32>
    %337 = vector.extract_strided_slice %324 {offsets = [16, 0], sizes = [128, 32], strides = [1, 1]} : vector<144x32xf32> to vector<128x32xf32>
    %c2 = arith.constant 2 : index
    %c0_57 = arith.constant 0 : index
    %c0_58 = arith.constant 0 : index
    %338 = vector.load %arg7[%c2, %c0_57, %c0_58] : memref<3x32x4xf32, #tpu.memory_space<vmem>>, vector<1x32x4xf32>
    %339 = vector.shape_cast %338 : vector<1x32x4xf32> to vector<32x4xf32>
    %cst_59 = arith.constant dense<0.000000e+00> : vector<128x4xf32>
    %340 = tpu.matmul %337, %339, %cst_59 {dimension_numbers = #tpu.dot_dimension_numbers<[1], [0], [0], [1], [0, 0, 1, 1], [], []>} : vector<128x32xf32>, vector<32x4xf32>, vector<128x4xf32> -> vector<128x4xf32>
    %341 = arith.addf %336, %340 : vector<128x4xf32>
    %c0_60 = arith.constant 0 : index
    %c0_61 = arith.constant 0 : index
    %342 = vector.load %arg9[%c0_60, %c0_61] : memref<128x4xf32, #tpu.memory_space<vmem>>, vector<128x4xf32>
    %343 = arith.mulf %342, %322 : vector<128x4xf32>
    %c0_62 = arith.constant 0 : index
    %c0_63 = arith.constant 0 : index
    %344 = vector.load %arg10[%c0_62, %c0_63] : memref<128x4xf32, #tpu.memory_space<vmem>>, vector<128x4xf32>
    %345 = arith.mulf %344, %341 : vector<128x4xf32>
    %346 = arith.addf %343, %345 : vector<128x4xf32>
    %c0_64 = arith.constant 0 : index
    %c0_65 = arith.constant 0 : index
    %347 = vector.load %arg11[%c0_64, %c0_65] : memref<128x4xf32, #tpu.memory_space<vmem>>, vector<128x4xf32>
    tpu.vector_store %arg11[%c0_64, %c0_65], %346 {strides = array<i32>} : memref<128x4xf32, #tpu.memory_space<vmem>>, vector<128x4xf32>,
    return
  }
  func.func @transform_0(%arg0: i32) -> (i32, i32) {
    %c0_i32 = arith.constant 0 : i32
    %c0_i32_0 = arith.constant 0 : i32
    return %arg0, %c0_i32 : i32, i32
  }
  func.func @transform_1(%arg0: i32) -> (i32, i32) {
    %c0_i32 = arith.constant 0 : i32
    %c0_i32_0 = arith.constant 0 : i32
    %c0_i32_1 = arith.constant 0 : i32
    return %c0_i32, %c0_i32_0 : i32, i32
  }
  func.func @transform_2(%arg0: i32) -> (i32, i32) {
    %c0_i32 = arith.constant 0 : i32
    %c0_i32_0 = arith.constant 0 : i32
    %c0_i32_1 = arith.constant 0 : i32
    return %c0_i32, %c0_i32_0 : i32, i32
  }
  func.func @transform_3(%arg0: i32) -> (i32, i32) {
    %c0_i32 = arith.constant 0 : i32
    %c0_i32_0 = arith.constant 0 : i32
    %c0_i32_1 = arith.constant 0 : i32
    return %c0_i32, %c0_i32_0 : i32, i32
  }
  func.func @transform_4(%arg0: i32) -> (i32, i32) {
    %c0_i32 = arith.constant 0 : i32
    %c0_i32_0 = arith.constant 0 : i32
    %c0_i32_1 = arith.constant 0 : i32
    return %c0_i32, %c0_i32_0 : i32, i32
  }
  func.func @transform_5(%arg0: i32) -> (i32, i32) {
    %c0_i32 = arith.constant 0 : i32
    %c0_i32_0 = arith.constant 0 : i32
    %c0_i32_1 = arith.constant 0 : i32
    return %c0_i32, %c0_i32_0 : i32, i32
  }
  func.func @transform_6(%arg0: i32) -> (i32, i32, i32) {
    %c0_i32 = arith.constant 0 : i32
    %c0_i32_0 = arith.constant 0 : i32
    %c0_i32_1 = arith.constant 0 : i32
    %c0_i32_2 = arith.constant 0 : i32
    return %c0_i32, %c0_i32_0, %c0_i32_1 : i32, i32, i32
  }
  func.func @transform_7(%arg0: i32) -> (i32, i32) {
    %c0_i32 = arith.constant 0 : i32
    %c0_i32_0 = arith.constant 0 : i32
    %c0_i32_1 = arith.constant 0 : i32
    return %c0_i32, %c0_i32_0 : i32, i32
  }
  func.func @transform_8(%arg0: i32) -> (i32, i32) {
    %c0_i32 = arith.constant 0 : i32
    %c0_i32_0 = arith.constant 0 : i32
    %c0_i32_1 = arith.constant 0 : i32
    return %c0_i32, %c0_i32_0 : i32, i32
  }
  func.func @transform_9(%arg0: i32) -> (i32, i32) {
    %c0_i32 = arith.constant 0 : i32
    %c0_i32_0 = arith.constant 0 : i32
    %c0_i32_1 = arith.constant 0 : i32
    return %c0_i32, %c0_i32_0 : i32, i32
  }
  func.func @transform_10(%arg0: i32) -> (i32, i32) {
    %c0_i32 = arith.constant 0 : i32
    %c0_i32_0 = arith.constant 0 : i32
    return %arg0, %c0_i32 : i32, i32
  }
}

</mosaic_0001>

<bundles_post_ra>
// kernel: tpu_custom_call.1
= control target key start
LH: loop header
LB: loop body
LE: loop exit
PB: predicated region body
PF: predicated region fallthrough
CT: control target
= control target key end

     0   :  { %vm116_vm0 = vcmask 1043456   ;;  %v3619_v0 = vmov 0.0|0.0   ;;  %vm3620_vm1 = vmmov 1   ;;  %v3621_v4 = vmov 0.0   ;;  %s3623_s11 = smov 32   ;;  %s3624_s14 = smov 64   ;;  %s4613_s1 = inlined_call_operand.vmem [shape: f32[12,160], index: 1, kind: input, shape index: {}]   ;;  %s4614_s3 = inlined_call_operand.vmem [shape: f32[32,128], index: 3, kind: input, shape index: {}]   ;;  %s4615_s0 = inlined_call_operand.vmem [shape: f32[128,12], index: 0, kind: input, shape index: {}]   ;;  %s4616_s2 = inlined_call_operand.vmem [shape: f32[1,160], index: 2, kind: input, shape index: {}]   ;;  %s4617_s4 = inlined_call_operand.vmem [shape: f32[32,4], index: 4, kind: input, shape index: {}]   ;;  %s4618_s6 = inlined_call_operand.vmem [shape: f32[3,32,4], index: 6, kind: input, shape index: {}]   ;;  %s4619_s5 = inlined_call_operand.vmem [shape: f32[1,4], index: 5, kind: input, shape index: {}]   ;;  %s4620_s7 = inlined_call_operand.vmem [shape: f32[1,4], index: 7, kind: input, shape index: {}]   ;;  %s4621_s8 = inlined_call_operand.vmem [shape: f32[128,4], index: 8, kind: input, shape index: {}]   ;;  %s4622_s9 = inlined_call_operand.vmem [shape: f32[128,4], index: 9, kind: input, shape index: {}]   ;;  %s4623_s10 = inlined_call_operand.vmem [shape: f32[128,4], index: 10, kind: output, shape index: {}]  }
   0x1   :  { %3308 = vmatprep.subr.bf16.mxu1 %v3619_v0  ;;  %v52_v1 = vld [vmem:[%s4613_s1 + $0x8] sm:$0xff]  ;;  %v54_v2 = vld [vmem:[%s4613_s1 + $0x18] sm:$0xf]  ;;  %vm3687_vm2 = vmpackc.low %vm116_vm0, %vm3620_vm1  ;;  %187 = vmatprep.mubr.f32.mxu0 %v3621_v4  ;;  %vm3622_vm3 = vmmov 0   ;;  %vm67_vm4 = vcmask 97280   ;;  %v57_v16 = vlaneseq  ;;  %vm304_vm5 = vcmask 261120  }
   0x2   :  { %v3302_v5 = vpack.c.bf16 %v54_v2, %v52_v1  ;;  %v300_v6 = vld [vmem:[%s4614_s3] sm:$0xff]  ;;  %v301_v7 = vld [vmem:[%s4614_s3 + $0x8] sm:$0xff]  ;;  %3006 = vmatprep.mubr.msk.f32.mxu1 %vm3622_vm3, %v3621_v4  ;;  %v53_v10 = vld [vmem:[%s4613_s1 + $0x10] sm:$0xf]  ;;  %vm2696_vm6 = vcmask 31744  }
   0x3   :  { %v51_v8 = vld [vmem:[%s4613_s1] sm:$0xff]  ;;  %v3703_v9 = vpack.c.bf16 %v301_v7, %v300_v6  ;;  %v302_v11 = vld [vmem:[%s4614_s3 + $0x10] sm:$0xff]  ;;  %v303_v13 = vld [vmem:[%s4614_s3 + $0x18] sm:$0xff]  ;;  %v3741_v17 = vshrl.u32 %v57_v16, 7 }
   0x4   :  { %3304 = vmatprep.subr.msk.bf16.mxu0 %vm3687_vm2, %v3302_v5  ;;  %v3305_v12 = vpack.c.bf16 %v53_v10, %v51_v8  ;;  %v3717_v14 = vpack.c.bf16 %v303_v13, %v302_v11  ;;  %v35_v15 = vld [vmem:[%s4615_s0] sm:$0xff]  ;;  %v36_v37 = vld [vmem:[%s4615_s0 + $0x8] sm:$0xff]  ;;  %v37_v58 = vld [vmem:[%s4615_s0 + $0x10] sm:$0xff] }
   0x5   :  { %3310 = vmatpush3.bf16.msra.mxu1 %v3703_v9  ;;  %v59_v18 = vsub.s32 0, %v3741_v17  ;;  %v55_v19 = vld [vmem:[%s4616_s2] sm:$0x3] }
   0x6   :  { %3307 = vmatpush1.bf16.msk.msra.mxu0 %vm3687_vm2, %v3305_v12  ;;  %3311 = vmatprep.subr.bf16.mxu1 %v3619_v0 }
   0x7   :  { %3356 = vmatprep.subr.bf16.mxu0 %v3619_v0  ;;  %v3747_v20 = vrot.slane %v55_v19, %v59_v18 }
   0x9   :  { %2719 = vmatmul.mubr.msk.f32.vlgmr.msra.gmra.mrb[0].mxu0 %vm67_vm4, %v35_v15  ;;  %3313 = vmatpush3.bf16.msra.mxu1 %v3717_v14 }
   0xa   :  { %3314 = vmatprep.subr.bf16.mxu1 %v3619_v0  ;;  %193 = vmatprep.mubr.f32.mxu0 %v3621_v4 }
   0xb   :  { %3358 = vmatpush3.bf16.msra.mxu0 %v3703_v9 }
   0xc   :  { %3007 = vmatmul.mubr.f32.vlgmr.msra.gmra.mrb[0].mxu1 %v3621_v4  ;;  %3359 = vmatprep.subr.bf16.mxu0 %v3619_v0 }
   0xd   :  { %3316 = vmatpush3.bf16.msra.mxu1 %v3703_v9  ;;  %3017 = vmatprep.mubr.msk.f32.mxu1 %vm3622_vm3, %v3621_v4 }
   0xe   :  { %3317 = vmatprep.subr.bf16.mxu1 %v3619_v0  ;;  %2720 = vmatmul.mubr.msk.f32.gmra.mrb[2].mxu0 %vm67_vm4, %v36_v37 }
   0xf   :  { %3361 = vmatpush3.bf16.msra.mxu0 %v3717_v14  ;;  %199 = vmatprep.mubr.f32.mxu0 %v3621_v4 }
  0x10   :  { %3368 = vmatprep.subr.bf16.mxu0 %v3619_v0 }
  0x11   :  { %3319 = vmatpush3.bf16.msra.mxu1 %v3717_v14 }
  0x12   :  { %3320 = vmatprep.subr.bf16.mxu1 %v3619_v0  ;;  %2721 = vmatmul.mubr.msk.f32.gmra.mrb[4].mxu0 %vm67_vm4, %v37_v58 }
  0x13   :  { %205 = vmatprep.mubr.f32.mxu0 %v3621_v4 }
  0xdc   :  { %v189_v21 = vpop.f32.mrb[0].mxu0 }
  0xdd   :  { %v190_v22 = vadd.f32 %v189_v21, %v3747_v20  ;;  %v3750_v23 = vpop.f32.mrb[1].mxu0  ;;  %v38_v21 = vld [vmem:[%s4615_s0 + $0x18] sm:$0xff] }
  0xde   :  { %2722 = vmatmul.mubr.msk.f32.gmra.mrb[6].mxu0 %vm67_vm4, %v38_v21 }
  0xdf   :  { %v374_v24 = vpop.f32.mrb[0].mxu1  ;;  %211 = vmatprep.mubr.f32.mxu0 %v3621_v4 }
  0xe0   :  { %v378_v25 = vadd.f32 %v374_v24, %v190_v22  ;;  %v3008_v26 = vpop.f32.mrb[1].mxu1 }
  0xe1   :  { %v195_v41 = vpop.f32.mrb[2].mxu0 }
  0xe2   :  { %3490 = vtanh.f32 %v378_v25  ;;  %v2735_v28 = vmul.f32 -1.442695, %v378_v25  ;;  %v3761_v42 = vpop.f32.mrb[3].mxu0  ;;  %v196_v44 = vadd.f32 %v195_v41, %v3747_v20 }
  0xe4   :  { %3492 = vpow2.f32 %v2735_v28 }
  0xe5   :  { %v201_v62 = vpop.f32.mrb[4].mxu0 }
  0xe6   :  { %v3783_v63 = vpop.f32.mrb[5].mxu0  ;;  %v202_v2 = vadd.f32 %v201_v62, %v3747_v20 }
  0xec   :  { %v3491_v27 = vpop.eup %3490 }
  0xed   :  { %388 = vrot.lane.b32.xlu0 %v3491_v27, %s3623_s11 }
  0xee   :  { %v3493_v29 = vpop.eup %3492 }
  0xef   :  { %v382_v30 = vadd.f32 1.0, %v3493_v29 }
  0xf1   :  { %3494 = vrcp.f32 %v382_v30 }
  0xfb   :  { %v3495_v31 = vpop.eup %3494 }
  0xfc   :  { %v386_v34 = vmul.f32 0.0, %v3495_v31 }
 0x15f   :  { %v389_v32 = vpop.permute.xlu0 %388 }
 0x160   :  { %v391_v33 = vmul.f32 %v3495_v31, %v389_v32 }
 0x162   :  { %393 = vrot.lane.b32.xlu0 %v391_v33, %s3623_s11 }
 0x1b1   :  { %v207_v26 = vpop.f32.mrb[6].mxu0 }
 0x1b2   :  { %v3805_v27 = vpop.f32.mrb[7].mxu0  ;;  %v208_v29 = vadd.f32 %v207_v26, %v3747_v20 }
 0x1d4   :  { %v394_v35 = vpop.permute.xlu0 %393 }
 0x1d5   :  { %v396_v36 = vadd.f32 %v394_v35, %v386_v34 }
 0x1d7   :  { %3496 = vtanh.f32 %v396_v36 }
 0x1e1   :  { %v3497_v38 = vpop.eup %3496 }
 0x1e2   :  { %399 = vrot.lane.b32.xlu1 %v3497_v38, %s3623_s11 }
 0x254   :  { %v400_v39 = vpop.permute.xlu1 %399 }
 0x255   :  { %v402_v40 = vmul.f32 %v3495_v31, %v400_v39 }
 0x257   :  { %404 = vrot.lane.b32.xlu1 %v402_v40, %s3624_s14 }
 0x2c9   :  { %v3763_v43 = vpop.permute.xlu1 %404 }
 0x2ca   :  { %3018 = vmatmul.mubr.msk.f32.vlgmr.msra.gmra.mrb[2].mxu1 %vm304_vm5, %v3763_v43 }
 0x2cb   :  { %3322 = vmatpush3.bf16.msra.mxu1 %v3703_v9  ;;  %3028 = vmatprep.mubr.msk.f32.mxu1 %vm3622_vm3, %v3621_v4 }
 0x2cc   :  { %3323 = vmatprep.subr.bf16.mxu1 %v3619_v0 }
 0x2cf   :  { %3325 = vmatpush3.bf16.msra.mxu1 %v3717_v14 }
 0x2d0   :  { %3326 = vmatprep.subr.bf16.mxu1 %v3619_v0 }
 0x39d   :  { %v474_v45 = vpop.f32.mrb[2].mxu1 }
 0x39e   :  { %v478_v46 = vadd.f32 %v474_v45, %v196_v44  ;;  %v3019_v47 = vpop.f32.mrb[3].mxu1  ;;  %v39_v45 = vld [vmem:[%s4615_s0 + $0x20] sm:$0xff] }
 0x39f   :  { %2723 = vmatmul.mubr.msk.f32.gmra.mrb[8].mxu0 %vm67_vm4, %v39_v45 }
 0x3a0   :  { %3498 = vtanh.f32 %v478_v46  ;;  %v2737_v49 = vmul.f32 -1.442695, %v478_v46  ;;  %217 = vmatprep.mubr.f32.mxu0 %v3621_v4 }
 0x3a2   :  { %3500 = vpow2.f32 %v2737_v49 }
 0x3aa   :  { %v3499_v48 = vpop.eup %3498 }
 0x3ab   :  { %488 = vrot.lane.b32.xlu0 %v3499_v48, %s3623_s11 }
 0x3ac   :  { %v3501_v50 = vpop.eup %3500 }
 0x3ad   :  { %v482_v51 = vadd.f32 1.0, %v3501_v50 }
 0x3af   :  { %3502 = vrcp.f32 %v482_v51 }
 0x3b9   :  { %v3503_v52 = vpop.eup %3502 }
 0x3ba   :  { %v486_v55 = vmul.f32 %v3503_v52, %v396_v36 }
 0x41d   :  { %v489_v53 = vpop.permute.xlu0 %488 }
 0x41e   :  { %v491_v54 = vmul.f32 %v3503_v52, %v489_v53 }
 0x420   :  { %493 = vrot.lane.b32.xlu1 %v491_v54, %s3623_s11 }
 0x472   :  { %v213_v49 = vpop.f32.mrb[8].mxu0 }
 0x473   :  { %v3827_v50 = vpop.f32.mrb[9].mxu0 }
 0x492   :  { %v494_v56 = vpop.permute.xlu1 %493 }
 0x493   :  { %v496_v57 = vadd.f32 %v494_v56, %v486_v55 }
 0x495   :  { %3504 = vtanh.f32 %v496_v57 }
 0x49f   :  { %v3505_v59 = vpop.eup %3504 }
 0x4a0   :  { %499 = vrot.lane.b32.xlu0 %v3505_v59, %s3623_s11 }
 0x512   :  { %v500_v60 = vpop.permute.xlu0 %499 }
 0x513   :  { %v502_v61 = vmul.f32 %v3503_v52, %v500_v60  ;;  %v214_v52 = vadd.f32 %v213_v49, %v3747_v20 }
 0x515   :  { %504 = vrot.lane.b32.xlu1 %v502_v61, %s3624_s14 }
 0x587   :  { %v3785_v1 = vpop.permute.xlu1 %504 }
 0x588   :  { %3029 = vmatmul.mubr.msk.f32.vlgmr.msra.gmra.mrb[4].mxu1 %vm304_vm5, %v3785_v1 }
 0x589   :  { %3328 = vmatpush3.bf16.msra.mxu1 %v3703_v9  ;;  %3039 = vmatprep.mubr.msk.f32.mxu1 %vm3622_vm3, %v3621_v4 }
 0x58a   :  { %3329 = vmatprep.subr.bf16.mxu1 %v3619_v0 }
 0x58d   :  { %3331 = vmatpush3.bf16.msra.mxu1 %v3717_v14 }
 0x58e   :  { %3332 = vmatprep.subr.bf16.mxu1 %v3619_v0 }
 0x65b   :  { %v574_v3 = vpop.f32.mrb[4].mxu1 }
 0x65c   :  { %v578_v5 = vadd.f32 %v574_v3, %v202_v2  ;;  %v3030_v6 = vpop.f32.mrb[5].mxu1 }
 0x65d   :  { %v40_v6 = vld [vmem:[%s4615_s0 + $0x28] sm:$0xff] }
 0x65e   :  { %3506 = vtanh.f32 %v578_v5  ;;  %v2739_v8 = vmul.f32 -1.442695, %v578_v5  ;;  %2724 = vmatmul.mubr.msk.f32.gmra.mrb[10].mxu0 %vm67_vm4, %v40_v6 }
 0x65f   :  { %223 = vmatprep.mubr.f32.mxu0 %v3621_v4 }
 0x660   :  { %3508 = vpow2.f32 %v2739_v8 }
 0x668   :  { %v3507_v7 = vpop.eup %3506 }
 0x669   :  { %588 = vrot.lane.b32.xlu0 %v3507_v7, %s3623_s11 }
 0x66a   :  { %v3509_v10 = vpop.eup %3508 }
 0x66b   :  { %v582_v11 = vadd.f32 1.0, %v3509_v10 }
 0x66d   :  { %3510 = vrcp.f32 %v582_v11 }
 0x677   :  { %v3511_v12 = vpop.eup %3510 }
 0x678   :  { %v586_v16 = vmul.f32 %v3511_v12, %v496_v57 }
 0x6db   :  { %v589_v13 = vpop.permute.xlu0 %588 }
 0x6dc   :  { %v591_v15 = vmul.f32 %v3511_v12, %v589_v13 }
 0x6de   :  { %593 = vrot.lane.b32.xlu1 %v591_v15, %s3623_s11 }
 0x731   :  { %v219_v11 = vpop.f32.mrb[10].mxu0 }
 0x732   :  { %v220_v15 = vadd.f32 %v219_v11, %v3747_v20 }
 0x750   :  { %v594_v18 = vpop.permute.xlu1 %593 }
 0x751   :  { %v596_v19 = vadd.f32 %v594_v18, %v586_v16 }
 0x753   :  { %3512 = vtanh.f32 %v596_v19 }
 0x75d   :  { %v3513_v22 = vpop.eup %3512 }
 0x75e   :  { %599 = vrot.lane.b32.xlu0 %v3513_v22, %s3623_s11 }
 0x7d0   :  { %v600_v24 = vpop.permute.xlu0 %599 }
 0x7d1   :  { %v602_v25 = vmul.f32 %v3511_v12, %v600_v24  ;;  %v3849_v12 = vpop.f32.mrb[11].mxu0 }
 0x7d3   :  { %604 = vrot.lane.b32.xlu1 %v602_v25, %s3624_s14 }
 0x845   :  { %v3807_v28 = vpop.permute.xlu1 %604 }
 0x846   :  { %3040 = vmatmul.mubr.msk.f32.vlgmr.msra.gmra.mrb[6].mxu1 %vm304_vm5, %v3807_v28 }
 0x847   :  { %3334 = vmatpush3.bf16.msra.mxu1 %v3703_v9  ;;  %3050 = vmatprep.mubr.msk.f32.mxu1 %vm3622_vm3, %v3621_v4 }
 0x848   :  { %3335 = vmatprep.subr.bf16.mxu1 %v3619_v0 }
 0x84b   :  { %3337 = vmatpush3.bf16.msra.mxu1 %v3717_v14 }
 0x84c   :  { %3338 = vmatprep.subr.bf16.mxu1 %v3619_v0 }
 0x919   :  { %v674_v30 = vpop.f32.mrb[6].mxu1 }
 0x91a   :  { %v678_v31 = vadd.f32 %v674_v30, %v208_v29  ;;  %v3041_v32 = vpop.f32.mrb[7].mxu1 }
 0x91c   :  { %3514 = vtanh.f32 %v678_v31  ;;  %v2741_v34 = vmul.f32 -1.442695, %v678_v31 }
 0x91e   :  { %3516 = vpow2.f32 %v2741_v34  ;;  %v41_v34 = vld [vmem:[%s4615_s0 + $0x30] sm:$0xff] }
 0x91f   :  { %2725 = vmatmul.mubr.msk.f32.gmra.mrb[12].mxu0 %vm67_vm4, %v41_v34  ;;  %v47_v34 = vld [vmem:[%s4615_s0 + $0x60] sm:$0xff] }
 0x920   :  { %229 = vmatprep.mubr.f32.mxu0 %v3621_v4 }
 0x926   :  { %v3515_v33 = vpop.eup %3514 }
 0x927   :  { %688 = vrot.lane.b32.xlu0 %v3515_v33, %s3623_s11 }
 0x928   :  { %v3517_v35 = vpop.eup %3516 }
 0x929   :  { %v682_v36 = vadd.f32 1.0, %v3517_v35 }
 0x92b   :  { %3518 = vrcp.f32 %v682_v36 }
 0x935   :  { %v3519_v37 = vpop.eup %3518 }
 0x936   :  { %v686_v40 = vmul.f32 %v3519_v37, %v596_v19 }
 0x999   :  { %v689_v38 = vpop.permute.xlu0 %688 }
 0x99a   :  { %v691_v39 = vmul.f32 %v3519_v37, %v689_v38 }
 0x99c   :  { %693 = vrot.lane.b32.xlu1 %v691_v39, %s3623_s11 }
 0x9f2   :  { %v225_v38 = vpop.f32.mrb[12].mxu0 }
 0x9f3   :  { %v3871_v39 = vpop.f32.mrb[13].mxu0 }
 0xa0e   :  { %v694_v41 = vpop.permute.xlu1 %693 }
 0xa0f   :  { %v696_v44 = vadd.f32 %v694_v41, %v686_v40  ;;  %v226_v41 = vadd.f32 %v225_v38, %v3747_v20 }
 0xa11   :  { %3520 = vtanh.f32 %v696_v44 }
 0xa1b   :  { %v3521_v46 = vpop.eup %3520 }
 0xa1c   :  { %699 = vrot.lane.b32.xlu0 %v3521_v46, %s3623_s11 }
 0xa8e   :  { %v700_v47 = vpop.permute.xlu0 %699 }
 0xa8f   :  { %v702_v48 = vmul.f32 %v3519_v37, %v700_v47 }
 0xa91   :  { %704 = vrot.lane.b32.xlu1 %v702_v48, %s3624_s14 }
 0xb03   :  { %v3829_v51 = vpop.permute.xlu1 %704 }
 0xb04   :  { %3051 = vmatmul.mubr.msk.f32.vlgmr.msra.gmra.mrb[8].mxu1 %vm304_vm5, %v3829_v51 }
 0xb05   :  { %3340 = vmatpush3.bf16.msra.mxu1 %v3703_v9  ;;  %3061 = vmatprep.mubr.msk.f32.mxu1 %vm3622_vm3, %v3621_v4 }
 0xb06   :  { %3341 = vmatprep.subr.bf16.mxu1 %v3619_v0 }
 0xb09   :  { %3343 = vmatpush3.bf16.msra.mxu1 %v3717_v14 }
 0xb0a   :  { %3344 = vmatprep.subr.bf16.mxu1 %v3619_v0 }
 0xbd7   :  { %v774_v53 = vpop.f32.mrb[8].mxu1 }
 0xbd8   :  { %v778_v54 = vadd.f32 %v774_v53, %v214_v52  ;;  %v3052_v55 = vpop.f32.mrb[9].mxu1 }
 0xbda   :  { %3522 = vtanh.f32 %v778_v54  ;;  %v2743_v57 = vmul.f32 -1.442695, %v778_v54 }
 0xbdc   :  { %3524 = vpow2.f32 %v2743_v57 }
 0xbe4   :  { %v3523_v56 = vpop.eup %3522 }
 0xbe5   :  { %788 = vrot.lane.b32.xlu0 %v3523_v56, %s3623_s11 }
 0xbe6   :  { %v3525_v58 = vpop.eup %3524 }
 0xbe7   :  { %v782_v59 = vadd.f32 1.0, %v3525_v58 }
 0xbe9   :  { %3526 = vrcp.f32 %v782_v59  ;;  %v42_v59 = vld [vmem:[%s4615_s0 + $0x38] sm:$0xff] }
 0xbea   :  { %2726 = vmatmul.mubr.msk.f32.gmra.mrb[14].mxu0 %vm67_vm4, %v42_v59 }
 0xbeb   :  { %235 = vmatprep.mubr.f32.mxu0 %v3621_v4 }
 0xbf3   :  { %v3527_v60 = vpop.eup %3526 }
 0xbf4   :  { %v786_v2 = vmul.f32 %v3527_v60, %v696_v44 }
 0xc57   :  { %v789_v61 = vpop.permute.xlu0 %788 }
 0xc58   :  { %v791_v62 = vmul.f32 %v3527_v60, %v789_v61 }
 0xc5a   :  { %793 = vrot.lane.b32.xlu1 %v791_v62, %s3623_s11 }
 0xccc   :  { %v794_v3 = vpop.permute.xlu1 %793 }
 0xccd   :  { %v796_v5 = vadd.f32 %v794_v3, %v786_v2  ;;  %v231_v2 = vpop.f32.mrb[14].mxu0 }
 0xcce   :  { %v3893_v3 = vpop.f32.mrb[15].mxu0  ;;  %v232_v6 = vadd.f32 %v231_v2, %v3747_v20 }
 0xccf   :  { %3528 = vtanh.f32 %v796_v5 }
 0xcd9   :  { %v3529_v7 = vpop.eup %3528 }
 0xcda   :  { %799 = vrot.lane.b32.xlu0 %v3529_v7, %s3623_s11 }
 0xd4c   :  { %v800_v8 = vpop.permute.xlu0 %799 }
 0xd4d   :  { %v802_v10 = vmul.f32 %v3527_v60, %v800_v8 }
 0xd4f   :  { %804 = vrot.lane.b32.xlu1 %v802_v10, %s3624_s14 }
 0xdc1   :  { %v3851_v13 = vpop.permute.xlu1 %804 }
 0xdc2   :  { %3062 = vmatmul.mubr.msk.f32.vlgmr.msra.gmra.mrb[10].mxu1 %vm304_vm5, %v3851_v13 }
 0xdc3   :  { %3346 = vmatpush3.bf16.msra.mxu1 %v3703_v9  ;;  %3072 = vmatprep.mubr.msk.f32.mxu1 %vm3622_vm3, %v3621_v4 }
 0xdc4   :  { %3347 = vmatprep.subr.bf16.mxu1 %v3619_v0 }
 0xdc7   :  { %3349 = vmatpush3.bf16.msra.mxu1 %v3717_v14 }
 0xdc8   :  { %3350 = vmatprep.subr.bf16.mxu1 %v3619_v0 }
 0xe95   :  { %v874_v16 = vpop.f32.mrb[10].mxu1 }
 0xe96   :  { %v878_v18 = vadd.f32 %v874_v16, %v220_v15  ;;  %v3063_v19 = vpop.f32.mrb[11].mxu1 }
 0xe98   :  { %3530 = vtanh.f32 %v878_v18  ;;  %v2745_v22 = vmul.f32 -1.442695, %v878_v18 }
 0xe9a   :  { %3532 = vpow2.f32 %v2745_v22 }
 0xea2   :  { %v3531_v21 = vpop.eup %3530 }
 0xea3   :  { %888 = vrot.lane.b32.xlu0 %v3531_v21, %s3623_s11 }
 0xea4   :  { %v3533_v24 = vpop.eup %3532 }
 0xea5   :  { %v882_v25 = vadd.f32 1.0, %v3533_v24 }
 0xea7   :  { %3534 = vrcp.f32 %v882_v25 }
 0xeb1   :  { %v3535_v26 = vpop.eup %3534 }
 0xeb2   :  { %v886_v31 = vmul.f32 %v3535_v26, %v796_v5 }
 0xf15   :  { %v889_v29 = vpop.permute.xlu0 %888 }
 0xf16   :  { %v891_v30 = vmul.f32 %v3535_v26, %v889_v29  ;;  %v43_v29 = vld [vmem:[%s4615_s0 + $0x40] sm:$0xff] }
 0xf17   :  { %2727 = vmatmul.mubr.msk.f32.gmra.mrb[16].mxu0 %vm67_vm4, %v43_v29 }
 0xf18   :  { %893 = vrot.lane.b32.xlu1 %v891_v30, %s3623_s11  ;;  %241 = vmatprep.mubr.f32.mxu0 %v3621_v4  ;;  %v44_v30 = vld [vmem:[%s4615_s0 + $0x48] sm:$0xff] }
 0xf1b   :  { %2728 = vmatmul.mubr.msk.f32.gmra.mrb[18].mxu0 %vm67_vm4, %v44_v30 }
 0xf1c   :  { %247 = vmatprep.mubr.f32.mxu0 %v3621_v4 }
 0xf8a   :  { %v894_v32 = vpop.permute.xlu1 %893 }
 0xf8b   :  { %v896_v33 = vadd.f32 %v894_v32, %v886_v31  ;;  %v45_v31 = vld [vmem:[%s4615_s0 + $0x50] sm:$0xff] }
 0xf8c   :  { %2729 = vmatmul.mubr.msk.f32.gmra.mrb[20].mxu0 %vm67_vm4, %v45_v31 }
 0xf8d   :  { %3536 = vtanh.f32 %v896_v33  ;;  %253 = vmatprep.mubr.f32.mxu0 %v3621_v4 }
 0xf97   :  { %v3537_v35 = vpop.eup %3536 }
 0xf98   :  { %899 = vrot.lane.b32.xlu0 %v3537_v35, %s3623_s11  ;;  %v48_v35 = vld [vmem:[%s4615_s0 + $0x68] sm:$0xff] }
0x100a   :  { %v900_v36 = vpop.permute.xlu0 %899 }
0x100b   :  { %v902_v37 = vmul.f32 %v3535_v26, %v900_v36  ;;  %v49_v36 = vld [vmem:[%s4615_s0 + $0x70] sm:$0xff] }
0x100d   :  { %904 = vrot.lane.b32.xlu1 %v902_v37, %s3624_s14  ;;  %v50_v37 = vld [vmem:[%s4615_s0 + $0x78] sm:$0xff] }
0x107f   :  { %v3873_v40 = vpop.permute.xlu1 %904 }
0x1080   :  { %3073 = vmatmul.mubr.msk.f32.vlgmr.msra.gmra.mrb[12].mxu1 %vm304_vm5, %v3873_v40 }
0x1081   :  { %3352 = vmatpush3.bf16.msra.mxu1 %v3703_v9  ;;  %3083 = vmatprep.mubr.msk.f32.mxu1 %vm3622_vm3, %v3621_v4 }
0x1082   :  { %3353 = vmatprep.subr.bf16.mxu1 %v3619_v0 }
0x1085   :  { %3355 = vmatpush3.bf16.msra.mxu1 %v3717_v14 }
0x1086   :  { %3362 = vmatprep.subr.bf16.mxu1 %v3619_v0 }
0x1153   :  { %v974_v44 = vpop.f32.mrb[12].mxu1 }
0x1154   :  { %v978_v45 = vadd.f32 %v974_v44, %v226_v41  ;;  %v3074_v46 = vpop.f32.mrb[13].mxu1  ;;  %v237_v44 = vpop.f32.mrb[16].mxu0 }
0x1155   :  { %v238_v2 = vadd.f32 %v237_v44, %v3747_v20 }
0x1156   :  { %3538 = vtanh.f32 %v978_v45  ;;  %v2747_v48 = vmul.f32 -1.442695, %v978_v45  ;;  %v3954_v45 = vpop.f32.mrb[17].mxu0 }
0x1157   :  { %v243_v46 = vpop.f32.mrb[18].mxu0 }
0x1158   :  { %3540 = vpow2.f32 %v2747_v48 }
0x1160   :  { %v3539_v47 = vpop.eup %3538 }
0x1161   :  { %988 = vrot.lane.b32.xlu0 %v3539_v47, %s3623_s11  ;;  %v3956_v47 = vpop.f32.mrb[19].mxu0 }
0x1162   :  { %v3541_v49 = vpop.eup %3540  ;;  %v3958_v48 = vpop.f32.mrb[20].mxu0 }
0x1163   :  { %v982_v52 = vadd.f32 1.0, %v3541_v49  ;;  %v3960_v49 = vpop.f32.mrb[21].mxu0 }
0x1165   :  { %3542 = vrcp.f32 %v982_v52 }
0x116f   :  { %v3543_v53 = vpop.eup %3542 }
0x1170   :  { %v986_v56 = vmul.f32 %v3543_v53, %v896_v33  ;;  %v46_v33 = vld [vmem:[%s4615_s0 + $0x58] sm:$0xff] }
0x1171   :  { %2730 = vmatmul.mubr.msk.f32.gmra.mrb[22].mxu0 %vm67_vm4, %v46_v33 }
0x1172   :  { %259 = vmatprep.mubr.f32.mxu0 %v3621_v4 }
0x1175   :  { %2731 = vmatmul.mubr.msk.f32.gmra.mrb[24].mxu0 %vm67_vm4, %v47_v34 }
0x1176   :  { %265 = vmatprep.mubr.f32.mxu0 %v3621_v4 }
0x1179   :  { %2732 = vmatmul.mubr.msk.f32.gmra.mrb[26].mxu0 %vm67_vm4, %v48_v35 }
0x117a   :  { %271 = vmatprep.mubr.f32.mxu0 %v3621_v4 }
0x117d   :  { %2733 = vmatmul.mubr.msk.f32.gmra.mrb[28].mxu0 %vm67_vm4, %v49_v36 }
0x117e   :  { %277 = vmatprep.mubr.f32.mxu0 %v3621_v4 }
0x1181   :  { %2734 = vmatmul.mubr.msk.f32.gmra.mrb[30].mxu0 %vm67_vm4, %v50_v37 }
0x1182   :  { %3094 = vmatprep.mubr.msk.f32.mxu0 %vm3622_vm3, %v3621_v4 }
0x11d3   :  { %v989_v54 = vpop.permute.xlu0 %988 }
0x11d4   :  { %v991_v55 = vmul.f32 %v3543_v53, %v989_v54 }
0x11d6   :  { %993 = vrot.lane.b32.xlu1 %v991_v55, %s3623_s11 }
0x1244   :  { %v3962_v52 = vpop.f32.mrb[22].mxu0 }
0x1248   :  { %v994_v57 = vpop.permute.xlu1 %993 }
0x1249   :  { %v996_v58 = vadd.f32 %v994_v57, %v986_v56 }
0x124b   :  { %3544 = vtanh.f32 %v996_v58 }
0x1255   :  { %v3545_v60 = vpop.eup %3544 }
0x1256   :  { %999 = vrot.lane.b32.xlu0 %v3545_v60, %s3623_s11 }
0x12c8   :  { %v1000_v61 = vpop.permute.xlu0 %999 }
0x12c9   :  { %v1002_v62 = vmul.f32 %v3543_v53, %v1000_v61  ;;  %v3964_v53 = vpop.f32.mrb[23].mxu0 }
0x12ca   :  { %v3966_v54 = vpop.f32.mrb[24].mxu0 }
0x12cb   :  { %1004 = vrot.lane.b32.xlu1 %v1002_v62, %s3624_s14  ;;  %v3968_v55 = vpop.f32.mrb[25].mxu0 }
0x12cc   :  { %v3970_v56 = vpop.f32.mrb[26].mxu0 }
0x12cd   :  { %v3972_v57 = vpop.f32.mrb[27].mxu0 }
0x133d   :  { %v3895_v5 = vpop.permute.xlu1 %1004 }
0x133e   :  { %3084 = vmatmul.mubr.msk.f32.vlgmr.msra.gmra.mrb[14].mxu1 %vm304_vm5, %v3895_v5 }
0x133f   :  { %3364 = vmatpush3.bf16.msra.mxu1 %v3703_v9  ;;  %3105 = vmatprep.mubr.msk.f32.mxu1 %vm3622_vm3, %v3621_v4 }
0x1340   :  { %3365 = vmatprep.subr.bf16.mxu1 %v3619_v0 }
0x1343   :  { %3367 = vmatpush3.bf16.msra.mxu1 %v3717_v14 }
0x1344   :  { %3374 = vmatprep.subr.bf16.mxu1 %v3619_v0 }
0x1411   :  { %v1074_v7 = vpop.f32.mrb[14].mxu1 }
0x1412   :  { %v1078_v8 = vadd.f32 %v1074_v7, %v232_v6  ;;  %v3085_v10 = vpop.f32.mrb[15].mxu1 }
0x1414   :  { %3546 = vtanh.f32 %v1078_v8  ;;  %v2749_v15 = vmul.f32 -1.442695, %v1078_v8 }
0x1416   :  { %3548 = vpow2.f32 %v2749_v15 }
0x141e   :  { %v3547_v11 = vpop.eup %3546 }
0x141f   :  { %1088 = vrot.lane.b32.xlu0 %v3547_v11, %s3623_s11 }
0x1420   :  { %v3549_v16 = vpop.eup %3548 }
0x1421   :  { %v1082_v18 = vadd.f32 1.0, %v3549_v16 }
0x1423   :  { %3550 = vrcp.f32 %v1082_v18 }
0x142d   :  { %v3551_v19 = vpop.eup %3550 }
0x142e   :  { %v1086_v24 = vmul.f32 %v3551_v19, %v996_v58  ;;  %v3974_v58 = vpop.f32.mrb[28].mxu0 }
0x142f   :  { %v3976_v59 = vpop.f32.mrb[29].mxu0 }
0x1430   :  { %v3978_v60 = vpop.f32.mrb[30].mxu0 }
0x1431   :  { %v3980_v61 = vpop.f32.mrb[31].mxu0 }
0x1491   :  { %v1089_v21 = vpop.permute.xlu0 %1088 }
0x1492   :  { %v1091_v22 = vmul.f32 %v3551_v19, %v1089_v21 }
0x1494   :  { %1093 = vrot.lane.b32.xlu1 %v1091_v22, %s3623_s11 }
0x1506   :  { %v1094_v25 = vpop.permute.xlu1 %1093 }
0x1507   :  { %v3908_v26 = vadd.f32 %v1094_v25, %v1086_v24 }
0x1509   :  { %3552 = vtanh.f32 %v3908_v26 }
0x1513   :  { %v3553_v32 = vpop.eup %3552 }
0x1514   :  { %1099 = vrot.lane.b32.xlu0 %v3553_v32, %s3623_s11 }
0x1586   :  { %v1100_v38 = vpop.permute.xlu0 %1099 }
0x1587   :  { %v1102_v41 = vmul.f32 %v3551_v19, %v1100_v38 }
0x1589   :  { %1104 = vrot.lane.b32.xlu1 %v1102_v41, %s3624_s14 }
0x15fb   :  { %v3982_v62 = vpop.permute.xlu1 %1104 }
0x15fc   :  { %3095 = vmatmul.mubr.msk.f32.vlgmr.msra.gmra.mrb[32].mxu0 %vm304_vm5, %v3982_v62 }
0x15fd   :  { %3370 = vmatpush3.bf16.msra.mxu0 %v3703_v9  ;;  %3116 = vmatprep.mubr.msk.f32.mxu0 %vm3622_vm3, %v3621_v4 }
0x15fe   :  { %3371 = vmatprep.subr.bf16.mxu0 %v3619_v0 }
0x1601   :  { %3373 = vmatpush3.bf16.msra.mxu0 %v3717_v14 }
0x1602   :  { %3380 = vmatprep.subr.bf16.mxu0 %v3619_v0 }
0x16cf   :  { %v1174_v6 = vpop.f32.mrb[32].mxu0 }
0x16d0   :  { %v1178_v7 = vadd.f32 %v1174_v6, %v238_v2  ;;  %v3096_v8 = vpop.f32.mrb[33].mxu0 }
0x16d2   :  { %3554 = vtanh.f32 %v1178_v7  ;;  %v2751_v11 = vmul.f32 -1.442695, %v1178_v7 }
0x16d4   :  { %3556 = vpow2.f32 %v2751_v11 }
0x16dc   :  { %v3555_v10 = vpop.eup %3554 }
0x16dd   :  { %1188 = vrot.lane.b32.xlu0 %v3555_v10, %s3623_s11 }
0x16de   :  { %v3557_v15 = vpop.eup %3556 }
0x16df   :  { %v1182_v16 = vadd.f32 1.0, %v3557_v15 }
0x16e1   :  { %3558 = vrcp.f32 %v1182_v16 }
0x16eb   :  { %v3559_v18 = vpop.eup %3558 }
0x16ec   :  { %v1186_v22 = vmul.f32 %v3559_v18, %v3908_v26  ;;  %v244_v26 = vadd.f32 %v243_v46, %v3747_v20 }
0x174f   :  { %v1189_v19 = vpop.permute.xlu0 %1188 }
0x1750   :  { %v1191_v21 = vmul.f32 %v3559_v18, %v1189_v19 }
0x1752   :  { %1193 = vrot.lane.b32.xlu1 %v1191_v21, %s3623_s11 }
0x17c4   :  { %v1194_v24 = vpop.permute.xlu1 %1193 }
0x17c5   :  { %v1196_v25 = vadd.f32 %v1194_v24, %v1186_v22 }
0x17c7   :  { %3560 = vtanh.f32 %v1196_v25 }
0x17d1   :  { %v3561_v29 = vpop.eup %3560 }
0x17d2   :  { %1199 = vrot.lane.b32.xlu0 %v3561_v29, %s3623_s11 }
0x1844   :  { %v1200_v30 = vpop.permute.xlu0 %1199 }
0x1845   :  { %v1202_v31 = vmul.f32 %v3559_v18, %v1200_v30  ;;  %v250_v18 = vadd.f32 %v3958_v48, %v3747_v20 }
0x1847   :  { %1204 = vrot.lane.b32.xlu1 %v1202_v31, %s3624_s14 }
0x18b9   :  { %v3998_v32 = vpop.permute.xlu1 %1204 }
0x18ba   :  { %3106 = vmatmul.mubr.msk.f32.vlgmr.msra.gmra.mrb[16].mxu1 %vm304_vm5, %v3998_v32 }
0x18bb   :  { %3376 = vmatpush3.bf16.msra.mxu1 %v3703_v9  ;;  %3127 = vmatprep.mubr.msk.f32.mxu1 %vm3622_vm3, %v3621_v4 }
0x18bc   :  { %3377 = vmatprep.subr.bf16.mxu1 %v3619_v0 }
0x18bf   :  { %3379 = vmatpush3.bf16.msra.mxu1 %v3717_v14 }
0x18c0   :  { %3386 = vmatprep.subr.bf16.mxu1 %v3619_v0 }
0x198d   :  { %v1274_v33 = vpop.f32.mrb[16].mxu1 }
0x198e   :  { %v1278_v34 = vadd.f32 %v1274_v33, %v244_v26  ;;  %v3107_v35 = vpop.f32.mrb[17].mxu1 }
0x1990   :  { %3562 = vtanh.f32 %v1278_v34  ;;  %v2753_v37 = vmul.f32 -1.442695, %v1278_v34 }
0x1992   :  { %3564 = vpow2.f32 %v2753_v37 }
0x199a   :  { %v3563_v36 = vpop.eup %3562 }
0x199b   :  { %1288 = vrot.lane.b32.xlu0 %v3563_v36, %s3623_s11 }
0x199c   :  { %v3565_v38 = vpop.eup %3564 }
0x199d   :  { %v1282_v41 = vadd.f32 1.0, %v3565_v38 }
0x199f   :  { %3566 = vrcp.f32 %v1282_v41 }
0x19a9   :  { %v3567_v44 = vpop.eup %3566 }
0x19aa   :  { %v1286_v7 = vmul.f32 %v3567_v44, %v1196_v25 }
0x1a0d   :  { %v1289_v2 = vpop.permute.xlu0 %1288 }
0x1a0e   :  { %v1291_v6 = vmul.f32 %v3567_v44, %v1289_v2 }
0x1a10   :  { %1293 = vrot.lane.b32.xlu1 %v1291_v6, %s3623_s11 }
0x1a82   :  { %v1294_v8 = vpop.permute.xlu1 %1293 }
0x1a83   :  { %v1296_v46 = vadd.f32 %v1294_v8, %v1286_v7 }
0x1a85   :  { %3568 = vtanh.f32 %v1296_v46 }
0x1a8f   :  { %v3569_v10 = vpop.eup %3568 }
0x1a90   :  { %1299 = vrot.lane.b32.xlu0 %v3569_v10, %s3623_s11 }
0x1b02   :  { %v1300_v11 = vpop.permute.xlu0 %1299 }
0x1b03   :  { %v1302_v15 = vmul.f32 %v3567_v44, %v1300_v11  ;;  %v256_v44 = vadd.f32 %v3962_v52, %v3747_v20 }
0x1b05   :  { %1304 = vrot.lane.b32.xlu1 %v1302_v15, %s3624_s14 }
0x1b77   :  { %v4013_v16 = vpop.permute.xlu1 %1304 }
0x1b78   :  { %3117 = vmatmul.mubr.msk.f32.vlgmr.msra.gmra.mrb[34].mxu0 %vm304_vm5, %v4013_v16 }
0x1b79   :  { %3382 = vmatpush3.bf16.msra.mxu0 %v3703_v9  ;;  %3138 = vmatprep.mubr.msk.f32.mxu0 %vm3622_vm3, %v3621_v4 }
0x1b7a   :  { %3383 = vmatprep.subr.bf16.mxu0 %v3619_v0 }
0x1b7d   :  { %3385 = vmatpush3.bf16.msra.mxu0 %v3717_v14 }
0x1b7e   :  { %3392 = vmatprep.subr.bf16.mxu0 %v3619_v0 }
0x1c4b   :  { %v1374_v19 = vpop.f32.mrb[34].mxu0 }
0x1c4c   :  { %v1378_v21 = vadd.f32 %v1374_v19, %v250_v18  ;;  %v3118_v22 = vpop.f32.mrb[35].mxu0 }
0x1c4e   :  { %3570 = vtanh.f32 %v1378_v21  ;;  %v2755_v25 = vmul.f32 -1.442695, %v1378_v21 }
0x1c50   :  { %3572 = vpow2.f32 %v2755_v25 }
0x1c58   :  { %v3571_v24 = vpop.eup %3570 }
0x1c59   :  { %1388 = vrot.lane.b32.xlu0 %v3571_v24, %s3623_s11 }
0x1c5a   :  { %v3573_v29 = vpop.eup %3572 }
0x1c5b   :  { %v1382_v30 = vadd.f32 1.0, %v3573_v29 }
0x1c5d   :  { %3574 = vrcp.f32 %v1382_v30 }
0x1c67   :  { %v3575_v31 = vpop.eup %3574 }
0x1c68   :  { %v1386_v34 = vmul.f32 %v3575_v31, %v1296_v46 }
0x1ccb   :  { %v1389_v26 = vpop.permute.xlu0 %1388 }
0x1ccc   :  { %v1391_v33 = vmul.f32 %v3575_v31, %v1389_v26 }
0x1cce   :  { %1393 = vrot.lane.b32.xlu1 %v1391_v33, %s3623_s11 }
0x1d40   :  { %v1394_v35 = vpop.permute.xlu1 %1393 }
0x1d41   :  { %v1396_v48 = vadd.f32 %v1394_v35, %v1386_v34 }
0x1d43   :  { %3576 = vtanh.f32 %v1396_v48 }
0x1d4d   :  { %v3577_v36 = vpop.eup %3576 }
0x1d4e   :  { %1399 = vrot.lane.b32.xlu0 %v3577_v36, %s3623_s11 }
0x1dc0   :  { %v1400_v37 = vpop.permute.xlu0 %1399 }
0x1dc1   :  { %v1402_v38 = vmul.f32 %v3575_v31, %v1400_v37  ;;  %v262_v31 = vadd.f32 %v3966_v54, %v3747_v20 }
0x1dc3   :  { %1404 = vrot.lane.b32.xlu1 %v1402_v38, %s3624_s14 }
0x1e35   :  { %v4029_v41 = vpop.permute.xlu1 %1404 }
0x1e36   :  { %3128 = vmatmul.mubr.msk.f32.vlgmr.msra.gmra.mrb[18].mxu1 %vm304_vm5, %v4029_v41 }
0x1e37   :  { %3388 = vmatpush3.bf16.msra.mxu1 %v3703_v9  ;;  %3149 = vmatprep.mubr.msk.f32.mxu1 %vm3622_vm3, %v3621_v4 }
0x1e38   :  { %3389 = vmatprep.subr.bf16.mxu1 %v3619_v0 }
0x1e3b   :  { %3391 = vmatpush3.bf16.msra.mxu1 %v3717_v14 }
0x1e3c   :  { %3398 = vmatprep.subr.bf16.mxu1 %v3619_v0 }
0x1f09   :  { %v1474_v2 = vpop.f32.mrb[18].mxu1 }
0x1f0a   :  { %v1478_v6 = vadd.f32 %v1474_v2, %v256_v44  ;;  %v3129_v7 = vpop.f32.mrb[19].mxu1 }
0x1f0c   :  { %3578 = vtanh.f32 %v1478_v6  ;;  %v2757_v46 = vmul.f32 -1.442695, %v1478_v6 }
0x1f0e   :  { %3580 = vpow2.f32 %v2757_v46 }
0x1f16   :  { %v3579_v8 = vpop.eup %3578 }
0x1f17   :  { %1488 = vrot.lane.b32.xlu0 %v3579_v8, %s3623_s11 }
0x1f18   :  { %v3581_v10 = vpop.eup %3580 }
0x1f19   :  { %v1482_v11 = vadd.f32 1.0, %v3581_v10 }
0x1f1b   :  { %3582 = vrcp.f32 %v1482_v11 }
0x1f25   :  { %v3583_v15 = vpop.eup %3582 }
0x1f26   :  { %v1486_v21 = vmul.f32 %v3583_v15, %v1396_v48 }
0x1f89   :  { %v1489_v18 = vpop.permute.xlu0 %1488 }
0x1f8a   :  { %v1491_v19 = vmul.f32 %v3583_v15, %v1489_v18 }
0x1f8c   :  { %1493 = vrot.lane.b32.xlu1 %v1491_v19, %s3623_s11 }
0x1ffe   :  { %v1494_v22 = vpop.permute.xlu1 %1493 }
0x1fff   :  { %v1496_v52 = vadd.f32 %v1494_v22, %v1486_v21 }
0x2001   :  { %3584 = vtanh.f32 %v1496_v52 }
0x200b   :  { %v3585_v24 = vpop.eup %3584 }
0x200c   :  { %1499 = vrot.lane.b32.xlu0 %v3585_v24, %s3623_s11 }
0x207e   :  { %v1500_v25 = vpop.permute.xlu0 %1499 }
0x207f   :  { %v1502_v29 = vmul.f32 %v3583_v15, %v1500_v25  ;;  %v268_v15 = vadd.f32 %v3970_v56, %v3747_v20 }
0x2081   :  { %1504 = vrot.lane.b32.xlu1 %v1502_v29, %s3624_s14 }
0x20f3   :  { %v4045_v30 = vpop.permute.xlu1 %1504 }
0x20f4   :  { %3139 = vmatmul.mubr.msk.f32.vlgmr.msra.gmra.mrb[36].mxu0 %vm304_vm5, %v4045_v30 }
0x20f5   :  { %3394 = vmatpush3.bf16.msra.mxu0 %v3703_v9  ;;  %3160 = vmatprep.mubr.msk.f32.mxu0 %vm3622_vm3, %v3621_v4 }
0x20f6   :  { %3395 = vmatprep.subr.bf16.mxu0 %v3619_v0 }
0x20f9   :  { %3397 = vmatpush3.bf16.msra.mxu0 %v3717_v14 }
0x21c7   :  { %v1574_v26 = vpop.f32.mrb[36].mxu0 }
0x21c8   :  { %v1578_v33 = vadd.f32 %v1574_v26, %v262_v31  ;;  %v3140_v34 = vpop.f32.mrb[37].mxu0  ;;  %v1903_v26 = vld [vmem:[%s4617_s4] sm:$0xff] }
0x21ca   :  { %3586 = vtanh.f32 %v1578_v33  ;;  %v2759_v48 = vmul.f32 -1.442695, %v1578_v33  ;;  %v1904_v33 = vld [vmem:[%s4617_s4 + $0x8] sm:$0xff] }
0x21cb   :  { %v3404_v34 = vpack.c.bf16 %v1904_v33, %v1903_v26  ;;  %v63_v26 = vsub.s32 1, %v3741_v17  ;;  %v3618_v33 = vld [vmem:[%s4616_s2] sm:$0x3] }
0x21cc   :  { %3588 = vpow2.f32 %v2759_v48 }
0x21cd   :  { %3405 = vmatprep.subr.bf16.mxu0 %v3404_v34 }
0x21d4   :  { %v3587_v35 = vpop.eup %3586 }
0x21d5   :  { %1588 = vrot.lane.b32.xlu0 %v3587_v35, %s3623_s11 }
0x21d6   :  { %v3589_v36 = vpop.eup %3588 }
0x21d7   :  { %v1582_v37 = vadd.f32 1.0, %v3589_v36 }
0x21d9   :  { %3590 = vrcp.f32 %v1582_v37  ;;  %v1905_v37 = vld [vmem:[%s4617_s4 + $0x10] sm:$0xff] }
0x21e3   :  { %v3591_v38 = vpop.eup %3590 }
0x21e4   :  { %v1586_v6 = vmul.f32 %v3591_v38, %v1496_v52 }
0x2247   :  { %v1589_v44 = vpop.permute.xlu0 %1588 }
0x2248   :  { %v1591_v2 = vmul.f32 %v3591_v38, %v1589_v44 }
0x224a   :  { %1593 = vrot.lane.b32.xlu1 %v1591_v2, %s3623_s11 }
0x22bc   :  { %v1594_v7 = vpop.permute.xlu1 %1593 }
0x22bd   :  { %v1596_v54 = vadd.f32 %v1594_v7, %v1586_v6 }
0x22bf   :  { %3592 = vtanh.f32 %v1596_v54 }
0x22c9   :  { %v3593_v8 = vpop.eup %3592 }
0x22ca   :  { %1599 = vrot.lane.b32.xlu0 %v3593_v8, %s3623_s11 }
0x233c   :  { %v1600_v46 = vpop.permute.xlu0 %1599 }
0x233d   :  { %v1602_v10 = vmul.f32 %v3591_v38, %v1600_v46  ;;  %v1906_v38 = vld [vmem:[%s4617_s4 + $0x18] sm:$0xff] }
0x233e   :  { %v3408_v44 = vpack.c.bf16 %v1906_v38, %v1905_v37 }
0x233f   :  { %1604 = vrot.lane.b32.xlu1 %v1602_v10, %s3624_s14 }
0x23b1   :  { %v1605_v11 = vpop.permute.xlu1 %1604 }
0x23b2   :  { %3150 = vmatmul.mubr.msk.f32.vlgmr.msra.gmra.mrb[20].mxu1 %vm304_vm5, %v1605_v11 }
0x23b3   :  { %3400 = vmatpush3.bf16.msra.mxu1 %v3703_v9  ;;  %3171 = vmatprep.mubr.msk.f32.mxu1 %vm3622_vm3, %v3621_v4 }
0x23b4   :  { %3401 = vmatprep.subr.bf16.mxu1 %v3619_v0 }
0x23b7   :  { %3403 = vmatpush3.bf16.msra.mxu1 %v3717_v14 }
0x2485   :  { %v1674_v18 = vpop.f32.mrb[20].mxu1 }
0x2486   :  { %v1678_v19 = vadd.f32 %v1674_v18, %v268_v15  ;;  %v3151_v21 = vpop.f32.mrb[21].mxu1 }
0x2488   :  { %3594 = vtanh.f32 %v1678_v19  ;;  %v2761_v52 = vmul.f32 -1.442695, %v1678_v19 }
0x248a   :  { %3596 = vpow2.f32 %v2761_v52 }
0x2492   :  { %v3595_v22 = vpop.eup %3594 }
0x2493   :  { %1688 = vrot.lane.b32.xlu0 %v3595_v22, %s3623_s11 }
0x2494   :  { %v3597_v9 = vpop.eup %3596 }
0x2495   :  { %v1682_v24 = vadd.f32 1.0, %v3597_v9 }
0x2497   :  { %3598 = vrcp.f32 %v1682_v24 }
0x24a1   :  { %v3599_v25 = vpop.eup %3598 }
0x24a2   :  { %v1686_v14 = vmul.f32 %v3599_v25, %v1596_v54 }
0x2505   :  { %v1689_v29 = vpop.permute.xlu0 %1688 }
0x2506   :  { %v1691_v0 = vmul.f32 %v3599_v25, %v1689_v29  ;;  %v2800_v29 = vld [vmem:[%s4618_s6 + $0x28] sm:$0xff] }
0x2508   :  { %1693 = vrot.lane.b32.xlu1 %v1691_v0, %s3623_s11 }
0x257a   :  { %v1694_v31 = vpop.permute.xlu1 %1693 }
0x257b   :  { %v4070_v56 = vadd.f32 %v1694_v31, %v1686_v14 }
0x257d   :  { %3600 = vtanh.f32 %v4070_v56 }
0x2587   :  { %v3601_v35 = vpop.eup %3600 }
0x2588   :  { %1699 = vrot.lane.b32.xlu0 %v3601_v35, %s3623_s11 }
0x25fa   :  { %v1700_v48 = vpop.permute.xlu0 %1699 }
0x25fb   :  { %v1702_v36 = vmul.f32 %v3599_v25, %v1700_v48  ;;  %v2799_v25 = vld [vmem:[%s4618_s6 + $0x20] sm:$0xff]  ;;  %v2801_v48 = vld [vmem:[%s4618_s6 + $0x30] sm:$0xff] }
0x25fc   :  { %v3420_v0 = vpack.c.bf16 %v2800_v29, %v2799_v25 }
0x25fd   :  { %1704 = vrot.lane.b32.xlu1 %v1702_v36, %s3624_s14  ;;  %v2802_v36 = vld [vmem:[%s4618_s6 + $0x38] sm:$0xff] }
0x25fe   :  { %3421 = vmatprep.subr.bf16.mxu1 %v3420_v0  ;;  %v3424_v37 = vpack.c.bf16 %v2802_v36, %v2801_v48 }
0x266f   :  { %v1705_v2 = vpop.permute.xlu1 %1704 }
0x2670   :  { %3161 = vmatmul.mubr.msk.f32.vlgmr.msra.gmra.mrb[38].mxu0 %vm304_vm5, %v1705_v2 }
0x2671   :  { %3407 = vmatpush3.bf16.msra.mxu0 %v3404_v34  ;;  %3182 = vmatprep.mubr.msk.f32.mxu0 %vm304_vm5, %v3763_v43  ;;  %v274_v43 = vadd.f32 %v3974_v58, %v3747_v20  ;;  %v64_v34 = vrot.slane %v3618_v33, %v63_v26 }
0x2672   :  { %3409 = vmatprep.subr.bf16.mxu0 %v3408_v44 }
0x2673   :  { %v4163_v35 = vadd.f32 %v3750_v23, %v64_v34  ;;  %v2820_v23 = vld [vmem:[%s4618_s6 + $0x48] sm:$0xff]  ;;  %v252_v29 = vadd.f32 %v3960_v49, %v64_v34  ;;  %v270_v49 = vadd.f32 %v3972_v57, %v64_v34 }
0x2675   :  { %3411 = vmatpush3.bf16.msra.mxu0 %v3408_v44  ;;  %v284_v38 = vmax.f32 %v4163_v35, 0.0  ;;  %v2819_v44 = vld [vmem:[%s4618_s6 + $0x40] sm:$0xff] }
0x2676   :  { %v4380_v35 = vld [vmem:[%s4619_s5] ss:$0 sm:$0xff] }
0x2678   :  { %3183 = vmatmul.mubr.msk.f32.vlgmr.msra.gmra.mrb[40].mxu0 %vm304_vm5, %v3785_v1 }
0x2679   :  { %3185 = vmatprep.mubr.msk.f32.mxu0 %vm304_vm5, %v3807_v28 }
0x267c   :  { %3186 = vmatmul.mubr.msk.f32.gmra.mrb[42].mxu0 %vm304_vm5, %v3829_v51 }
0x267d   :  { %3188 = vmatprep.mubr.msk.f32.mxu0 %vm304_vm5, %v3851_v13 }
0x2680   :  { %3189 = vmatmul.mubr.msk.f32.gmra.mrb[44].mxu0 %vm304_vm5, %v3873_v40 }
0x2681   :  { %3191 = vmatprep.mubr.msk.f32.mxu0 %vm304_vm5, %v3895_v5 }
0x2684   :  { %3192 = vmatmul.mubr.msk.f32.gmra.mrb[46].mxu0 %vm304_vm5, %v3982_v62 }
0x2685   :  { %3194 = vmatprep.mubr.msk.f32.mxu0 %vm304_vm5, %v3998_v32 }
0x2688   :  { %3195 = vmatmul.mubr.msk.f32.gmra.mrb[48].mxu0 %vm304_vm5, %v4013_v16 }
0x2689   :  { %3197 = vmatprep.mubr.msk.f32.mxu0 %vm304_vm5, %v4029_v41 }
0x268c   :  { %3198 = vmatmul.mubr.msk.f32.gmra.mrb[50].mxu0 %vm304_vm5, %v4045_v30 }
0x268d   :  { %3200 = vmatprep.mubr.msk.f32.mxu0 %vm304_vm5, %v1605_v11 }
0x2690   :  { %3201 = vmatmul.mubr.msk.f32.gmra.mrb[52].mxu0 %vm304_vm5, %v1705_v2  ;;  %v198_v2 = vadd.f32 %v3761_v42, %v64_v34 }
0x2743   :  { %v1774_v1 = vpop.f32.mrb[38].mxu0 }
0x2744   :  { %v1778_v28 = vadd.f32 %v1774_v1, %v274_v43  ;;  %v3162_v51 = vpop.f32.mrb[39].mxu0  ;;  %v3428_v43 = vpack.c.bf16 %v2820_v23, %v2819_v44  ;;  %v204_v1 = vadd.f32 %v3783_v63, %v64_v34 }
0x2745   :  { %v2822_v51 = vld [vmem:[%s4618_s6 + $0x58] sm:$0xff] }
0x2746   :  { %3602 = vtanh.f32 %v1778_v28  ;;  %v2763_v11 = vmul.f32 -1.442695, %v1778_v28  ;;  %v2821_v28 = vld [vmem:[%s4618_s6 + $0x50] sm:$0xff]  ;;  %v4194_v42 = vmax.f32 %v204_v1, 0.0 }
0x2748   :  { %3604 = vpow2.f32 %v2763_v11  ;;  %v210_v11 = vadd.f32 %v3805_v27, %v64_v34  ;;  %v228_v27 = vadd.f32 %v3871_v39, %v64_v34 }
0x274a   :  { %v4201_v63 = vmax.f32 %v210_v11, 0.0 }
0x274b   :  { %v4116_v13 = vpop.f32.mrb[40].mxu0 }
0x274c   :  { %v4118_v40 = vpop.f32.mrb[41].mxu0 }
0x274f   :  { %v4120_v5 = vpop.f32.mrb[42].mxu0 }
0x2750   :  { %v3603_v62 = vpop.eup %3602  ;;  %v4122_v32 = vpop.f32.mrb[43].mxu0 }
0x2751   :  { %1788 = vrot.lane.b32.xlu0 %v3603_v62, %s3623_s11  ;;  %v4191_v62 = vmax.f32 %v198_v2, 0.0 }
0x2752   :  { %v3605_v15 = vpop.eup %3604 }
0x2753   :  { %v4125_v16 = vpop.f32.mrb[44].mxu0  ;;  %v1782_v18 = vadd.f32 1.0, %v3605_v15  ;;  %v3432_v15 = vpack.c.bf16 %v2822_v51, %v2821_v28 }
0x2754   :  { %v4127_v41 = vpop.f32.mrb[45].mxu0 }
0x2755   :  { %3606 = vrcp.f32 %v1782_v18  ;;  %v216_v18 = vadd.f32 %v3827_v50, %v64_v34 }
0x2757   :  { %v4129_v58 = vpop.f32.mrb[46].mxu0 }
0x2758   :  { %v4131_v30 = vpop.f32.mrb[47].mxu0 }
0x275b   :  { %v4133_v6 = vpop.f32.mrb[48].mxu0 }
0x275c   :  { %v4135_v7 = vpop.f32.mrb[49].mxu0 }
0x275f   :  { %v4137_v54 = vpop.f32.mrb[50].mxu0  ;;  %v3607_v19 = vpop.eup %3606 }
0x2760   :  { %v4139_v8 = vpop.f32.mrb[51].mxu0  ;;  %v1786_v52 = vmul.f32 %v3607_v19, %v4070_v56 }
0x2763   :  { %v4141_v46 = vpop.f32.mrb[52].mxu0 }
0x2764   :  { %v4143_v10 = vpop.f32.mrb[53].mxu0 }
0x27c3   :  { %v1789_v21 = vpop.permute.xlu0 %1788 }
0x27c4   :  { %v1791_v22 = vmul.f32 %v3607_v19, %v1789_v21  ;;  %v4204_v21 = vmax.f32 %v216_v18, 0.0 }
0x27c6   :  { %1793 = vrot.lane.b32.xlu1 %v1791_v22, %s3623_s11  ;;  %v234_v22 = vadd.f32 %v3893_v3, %v64_v34 }
0x27c8   :  { %v4221_v39 = vmax.f32 %v234_v22, 0.0 }
0x2838   :  { %v1794_v9 = vpop.permute.xlu1 %1793 }
0x2839   :  { %v4147_v24 = vadd.f32 %v1794_v9, %v1786_v52  ;;  %v4214_v52 = vmax.f32 %v228_v27, 0.0  ;;  %v246_v9 = vadd.f32 %v3956_v47, %v64_v34 }
0x283b   :  { %3608 = vtanh.f32 %v4147_v24  ;;  %v4231_v3 = vmax.f32 %v246_v9, 0.0 }
0x2845   :  { %v3609_v14 = vpop.eup %3608 }
0x2846   :  { %1799 = vrot.lane.b32.xlu0 %v3609_v14, %s3623_s11  ;;  %v264_v14 = vadd.f32 %v3968_v55, %v64_v34  ;;  %v282_v55 = vadd.f32 %v3980_v61, %v64_v34 }
0x2848   :  { %v299_v57 = vmax.f32 %v282_v55, 0.0  ;;  %v2065_v55 = vld [vmem:[%s4618_s6] sm:$0xff] }
0x28b8   :  { %v1800_v31 = vpop.permute.xlu0 %1799 }
0x28b9   :  { %v1802_v56 = vmul.f32 %v3607_v19, %v1800_v31  ;;  %v222_v19 = vadd.f32 %v3849_v12, %v64_v34  ;;  %v240_v12 = vadd.f32 %v3954_v45, %v64_v34  ;;  %v258_v45 = vadd.f32 %v3964_v53, %v64_v34 }
0x28ba   :  { %v4244_v31 = vmax.f32 %v264_v14, 0.0  ;;  %v4251_v53 = vmax.f32 %v270_v49, 0.0 }
0x28bb   :  { %1804 = vrot.lane.b32.xlu1 %v1802_v56, %s3624_s14  ;;  %v4211_v50 = vmax.f32 %v222_v19, 0.0  ;;  %v4224_v25 = vmax.f32 %v240_v12, 0.0  ;;  %v4241_v47 = vmax.f32 %v258_v45, 0.0  ;;  %v276_v56 = vadd.f32 %v3976_v59, %v64_v34 }
0x28bc   :  { %v280_v59 = vadd.f32 %v3978_v60, %v3747_v20 }
0x28bd   :  { %v4254_v26 = vmax.f32 %v276_v56, 0.0 }
0x292d   :  { %v1805_v17 = vpop.permute.xlu1 %1804 }
0x292e   :  { %3172 = vmatmul.mubr.msk.f32.vlgmr.msra.gmra.mrb[22].mxu1 %vm304_vm5, %v1805_v17  ;;  %3203 = vmatprep.mubr.msk.f32.mxu0 %vm304_vm5, %v1805_v17 }
0x292f   :  { %3423 = vmatpush3.bf16.msra.mxu1 %v3420_v0  ;;  %3246 = vmatprep.mubr.msk.f32.mxu1 %vm304_vm5, %v284_v38  ;;  %v4234_v0 = vmax.f32 %v252_v29, 0.0 }
0x2930   :  { %3425 = vmatprep.subr.bf16.mxu1 %v3424_v37 }
0x2933   :  { %3427 = vmatpush3.bf16.msra.mxu1 %v3424_v37 }
0x2934   :  { %3429 = vmatprep.subr.bf16.mxu1 %v3428_v43 }
0x2936   :  { %3247 = vmatmul.mubr.msk.f32.vlgmr.msra.gmra.mrb[24].mxu1 %vm304_vm5, %v4191_v62 }
0x2937   :  { %3249 = vmatprep.mubr.msk.f32.mxu1 %vm304_vm5, %v4194_v42  ;;  %3431 = vmatpush3.bf16.msra.mxu1 %v3428_v43 }
0x2938   :  { %3433 = vmatprep.subr.bf16.mxu1 %v3432_v15 }
0x293a   :  { %3250 = vmatmul.mubr.msk.f32.gmra.mrb[26].mxu1 %vm304_vm5, %v4201_v63 }
0x293b   :  { %3252 = vmatprep.mubr.msk.f32.mxu1 %vm304_vm5, %v4204_v21  ;;  %3435 = vmatpush3.bf16.msra.mxu1 %v3432_v15 }
0x293e   :  { %3253 = vmatmul.mubr.msk.f32.gmra.mrb[28].mxu1 %vm304_vm5, %v4211_v50 }
0x293f   :  { %3255 = vmatprep.mubr.msk.f32.mxu1 %vm304_vm5, %v4214_v52 }
0x2942   :  { %3256 = vmatmul.mubr.msk.f32.gmra.mrb[30].mxu1 %vm304_vm5, %v4221_v39 }
0x2943   :  { %3258 = vmatprep.mubr.msk.f32.mxu1 %vm304_vm5, %v4224_v25 }
0x2946   :  { %3259 = vmatmul.mubr.msk.f32.gmra.mrb[32].mxu1 %vm304_vm5, %v4231_v3 }
0x2947   :  { %3261 = vmatprep.mubr.msk.f32.mxu1 %vm304_vm5, %v4234_v0 }
0x294a   :  { %3262 = vmatmul.mubr.msk.f32.gmra.mrb[34].mxu1 %vm304_vm5, %v4241_v47 }
0x294b   :  { %3264 = vmatprep.mubr.msk.f32.mxu1 %vm304_vm5, %v4244_v31 }
0x294e   :  { %3265 = vmatmul.mubr.msk.f32.gmra.mrb[36].mxu1 %vm304_vm5, %v4251_v53 }
0x294f   :  { %3267 = vmatprep.mubr.msk.f32.mxu1 %vm304_vm5, %v4254_v26 }
0x2952   :  { %3268 = vmatmul.mubr.msk.f32.gmra.mrb[38].mxu1 %vm304_vm5, %v299_v57 }
0x2953   :  { %3278 = vmatprep.mubr.msk.f32.mxu1 %vm304_vm5, %v4191_v62 }
0x2956   :  { %3279 = vmatmul.mubr.msk.f32.vlgmr.msra.gmra.mrb[24].mxu1 %vm304_vm5, %v4194_v42 }
0x2957   :  { %3281 = vmatprep.mubr.msk.f32.mxu1 %vm304_vm5, %v4201_v63 }
0x295a   :  { %3282 = vmatmul.mubr.msk.f32.gmra.mrb[26].mxu1 %vm304_vm5, %v4204_v21 }
0x295b   :  { %3284 = vmatprep.mubr.msk.f32.mxu1 %vm304_vm5, %v4211_v50 }
0x295e   :  { %3285 = vmatmul.mubr.msk.f32.gmra.mrb[28].mxu1 %vm304_vm5, %v4214_v52 }
0x295f   :  { %3287 = vmatprep.mubr.msk.f32.mxu1 %vm304_vm5, %v4221_v39 }
0x2962   :  { %3288 = vmatmul.mubr.msk.f32.gmra.mrb[30].mxu1 %vm304_vm5, %v4224_v25 }
0x2963   :  { %3290 = vmatprep.mubr.msk.f32.mxu1 %vm304_vm5, %v4231_v3 }
0x2966   :  { %3291 = vmatmul.mubr.msk.f32.gmra.mrb[32].mxu1 %vm304_vm5, %v4234_v0 }
0x2967   :  { %3293 = vmatprep.mubr.msk.f32.mxu1 %vm304_vm5, %v4241_v47 }
0x296a   :  { %3294 = vmatmul.mubr.msk.f32.gmra.mrb[34].mxu1 %vm304_vm5, %v4244_v31 }
0x296b   :  { %3296 = vmatprep.mubr.msk.f32.mxu1 %vm304_vm5, %v4251_v53 }
0x296e   :  { %3297 = vmatmul.mubr.msk.f32.gmra.mrb[36].mxu1 %vm304_vm5, %v4254_v26 }
0x296f   :  { %3299 = vmatprep.mubr.msk.f32.mxu1 %vm304_vm5, %v299_v57  ;;  %v2066_v57 = vld [vmem:[%s4618_s6 + $0x8] sm:$0xff] }
0x2972   :  { %3300 = vmatmul.mubr.f32.gmra.mrb[38].mxu1 %v3621_v4 }
0x2a01   :  { %v1874_v61 = vpop.f32.mrb[22].mxu1 }
0x2a02   :  { %v1878_v33 = vadd.f32 %v1874_v61, %v280_v59  ;;  %v3173_v34 = vpop.f32.mrb[23].mxu1  ;;  %v2067_v59 = vld [vmem:[%s4618_s6 + $0x10] sm:$0xff]  ;;  %v3412_v61 = vpack.c.bf16 %v2066_v57, %v2065_v55 }
0x2a04   :  { %3610 = vtanh.f32 %v1878_v33  ;;  %v2765_v27 = vmul.f32 -1.442695, %v1878_v33  ;;  %3413 = vmatprep.subr.bf16.mxu0 %v3412_v61 }
0x2a05   :  { %3415 = vmatpush3.bf16.msra.mxu0 %v3412_v61 }
0x2a06   :  { %3612 = vpow2.f32 %v2765_v27 }
0x2a0e   :  { %v3611_v48 = vpop.eup %3610 }
0x2a0f   :  { %1888 = vrot.lane.b32.xlu0 %v3611_v48, %s3623_s11 }
0x2a10   :  { %v3613_v22 = vpop.eup %3612 }
0x2a11   :  { %v1882_v12 = vadd.f32 1.0, %v3613_v22 }
0x2a13   :  { %3614 = vrcp.f32 %v1882_v12  ;;  %v2001_v12 = vadd.f32 %v4120_v5, %v4380_v35  ;;  %v2618_v5 = vld [vmem:[%s4621_s8 + $0x10] sm:$0xff] }
0x2a1d   :  { %v3615_v9 = vpop.eup %3614 }
0x2a1e   :  { %v1886_v14 = vmul.f32 %v3615_v9, %v4147_v24  ;;  %v2068_v24 = vld [vmem:[%s4618_s6 + $0x18] sm:$0xff] }
0x2a1f   :  { %v3416_v33 = vpack.c.bf16 %v2068_v24, %v2067_v59  ;;  %v2650_v59 = vld [vmem:[%s4622_s9 + $0x10] sm:$0xff] }
0x2a21   :  { %3417 = vmatprep.subr.bf16.mxu0 %v3416_v33 }
0x2a22   :  { %3419 = vmatpush3.bf16.msra.mxu0 %v3416_v33 }
0x2a29   :  { %v4294_v36 = vpop.f32.mrb[24].mxu1 }
0x2a2a   :  { %v4296_v37 = vpop.f32.mrb[25].mxu1 }
0x2a2d   :  { %v4298_v17 = vpop.f32.mrb[26].mxu1 }
0x2a2e   :  { %v4300_v44 = vpop.f32.mrb[27].mxu1 }
0x2a31   :  { %v4302_v23 = vpop.f32.mrb[28].mxu1 }
0x2a32   :  { %v4304_v2 = vpop.f32.mrb[29].mxu1 }
0x2a35   :  { %v4306_v20 = vpop.f32.mrb[30].mxu1 }
0x2a36   :  { %v4308_v60 = vpop.f32.mrb[31].mxu1 }
0x2a39   :  { %v4310_v43 = vpop.f32.mrb[32].mxu1 }
0x2a3a   :  { %v4312_v1 = vpop.f32.mrb[33].mxu1 }
0x2a3d   :  { %v4314_v28 = vpop.f32.mrb[34].mxu1 }
0x2a3e   :  { %v4316_v51 = vpop.f32.mrb[35].mxu1 }
0x2a41   :  { %v4318_v11 = vpop.f32.mrb[36].mxu1 }
0x2a42   :  { %v4320_v15 = vpop.f32.mrb[37].mxu1 }
0x2a45   :  { %v4322_v18 = vpop.f32.mrb[38].mxu1 }
0x2a46   :  { %v4324_v19 = vpop.f32.mrb[39].mxu1 }
0x2a81   :  { %v1889_v29 = vpop.permute.xlu0 %1888 }
0x2a82   :  { %v1891_v45 = vmul.f32 %v3615_v9, %v1889_v29 }
0x2a84   :  { %1893 = vrot.lane.b32.xlu1 %v1891_v45, %s3623_s11 }
0x2af6   :  { %v1894_v49 = vpop.permute.xlu1 %1893 }
0x2af7   :  { %v1896_v56 = vadd.f32 %v1894_v49, %v1886_v14  ;;  %v1996_v14 = vadd.f32 %v4380_v35, %v4122_v32 }
0x2af9   :  { %3616 = vtanh.f32 %v1896_v56 }
0x2b03   :  { %v3617_v34 = vpop.eup %3616 }
0x2b04   :  { %1899 = vrot.lane.b32.xlu0 %v3617_v34, %s3623_s11  ;;  %v2011_v34 = vadd.f32 %v4125_v16, %v4380_v35 }
0x2b76   :  { %v1900_v48 = vpop.permute.xlu0 %1899 }
0x2b77   :  { %v1902_v27 = vmul.f32 %v3615_v9, %v1900_v48 }
0x2b79   :  { %1915 = vrot.lane.b32.xlu1 %v1902_v27, %s3624_s14 }
0x2beb   :  { %v1916_v22 = vpop.permute.xlu1 %1915 }
0x2bec   :  { %3204 = vmatmul.mubr.msk.f32.gmra.mrb[54].mxu0 %vm304_vm5, %v1916_v22  ;;  %v2634_v22 = vmul.f32 %v2618_v5, %v1996_v14  ;;  %v2031_v5 = vadd.f32 %v4133_v6, %v4380_v35 }
0x2bed   :  { %3214 = vmatprep.mubr.f32.mxu0 %v3621_v4 }
0x2bf0   :  { %3215 = vmatmul.mubr.msk.f32.vlgmr.msra.gmra.mrb[56].mxu0 %vm304_vm5, %v284_v38 }
0x2bf1   :  { %3217 = vmatprep.mubr.msk.f32.mxu0 %vm304_vm5, %v4191_v62  ;;  %v4387_v62 = vld [vmem:[%s4620_s7] ss:$0 sm:$0xff] }
0x2bf4   :  { %3218 = vmatmul.mubr.msk.f32.gmra.mrb[58].mxu0 %vm304_vm5, %v4194_v42  ;;  %v1991_v42 = vadd.f32 %v4116_v13, %v4380_v35 }
0x2bf5   :  { %3220 = vmatprep.mubr.msk.f32.mxu0 %vm304_vm5, %v4201_v63 }
0x2bf8   :  { %3221 = vmatmul.mubr.msk.f32.gmra.mrb[60].mxu0 %vm304_vm5, %v4204_v21  ;;  %v2617_v21 = vld [vmem:[%s4621_s8 + $0x8] sm:$0xff] }
0x2bf9   :  { %3223 = vmatprep.mubr.msk.f32.mxu0 %vm304_vm5, %v4211_v50  ;;  %v1986_v50 = vadd.f32 %v4380_v35, %v4118_v40  ;;  %v2633_v40 = vmul.f32 %v2617_v21, %v1991_v42  ;;  %v2621_v42 = vld [vmem:[%s4621_s8 + $0x28] sm:$0xff] }
0x2bfc   :  { %3224 = vmatmul.mubr.msk.f32.gmra.mrb[62].mxu0 %vm304_vm5, %v4214_v52 }
0x2bfd   :  { %3226 = vmatprep.mubr.msk.f32.mxu0 %vm304_vm5, %v4221_v39 }
0x2c00   :  { %3227 = vmatmul.mubr.msk.f32.gmra.mrb[64].mxu0 %vm304_vm5, %v4224_v25  ;;  %v2616_v25 = vld [vmem:[%s4621_s8] sm:$0xff] }
0x2c01   :  { %3229 = vmatprep.mubr.msk.f32.mxu0 %vm304_vm5, %v4231_v3  ;;  %v2649_v3 = vld [vmem:[%s4622_s9 + $0x8] sm:$0xff] }
0x2c04   :  { %3230 = vmatmul.mubr.msk.f32.gmra.mrb[66].mxu0 %vm304_vm5, %v4234_v0 }
0x2c05   :  { %3232 = vmatprep.mubr.msk.f32.mxu0 %vm304_vm5, %v4241_v47  ;;  %v2648_v47 = vld [vmem:[%s4622_s9] sm:$0xff] }
0x2c08   :  { %3233 = vmatmul.mubr.msk.f32.gmra.mrb[68].mxu0 %vm304_vm5, %v4244_v31 }
0x2c09   :  { %3235 = vmatprep.mubr.msk.f32.mxu0 %vm304_vm5, %v4251_v53 }
0x2c0c   :  { %3236 = vmatmul.mubr.msk.f32.gmra.mrb[70].mxu0 %vm304_vm5, %v4254_v26  ;;  %v2632_v26 = vmul.f32 %v2616_v25, %v1986_v50  ;;  %v2620_v50 = vld [vmem:[%s4621_s8 + $0x20] sm:$0xff] }
0x2cbf   :  { %v4375_v4 = vpop.f32.mrb[54].mxu0 }
0x2cc0   :  { %v4382_v38 = vpop.f32.mrb[55].mxu0 }
0x2cc3   :  { %v3216_v63 = vpop.f32.mrb[56].mxu0 }
0x2cc4   :  { %v2266_v52 = vadd.f32 %v3216_v63, %v4387_v62  ;;  %v2180_v39 = vpop.f32.mrb[57].mxu0  ;;  %v2653_v63 = vld [vmem:[%s4622_s9 + $0x28] sm:$0xff] }
0x2cc5   :  { %v2265_v13 = vadd.f32 %v4387_v62, %v2180_v39 }
0x2cc6   :  { %v3437_v0 = vadd.f32 %v4294_v36, %v2266_v52  ;;  %v2619_v36 = vld [vmem:[%s4621_s8 + $0x18] sm:$0xff] }
0x2cc7   :  { %v3439_v31 = vadd.f32 %v4296_v37, %v2265_v13  ;;  %v3219_v53 = vpop.f32.mrb[58].mxu0  ;;  %v2651_v37 = vld [vmem:[%s4622_s9 + $0x18] sm:$0xff]  ;;  %v2635_v33 = vmul.f32 %v2619_v36, %v2001_v12 }
0x2cc8   :  { %v2665_v9 = vmul.f32 %v3437_v0, %v2649_v3  ;;  %v2268_v29 = vadd.f32 %v3219_v53, %v4387_v62  ;;  %v2190_v45 = vpop.f32.mrb[59].mxu0  ;;  %v2637_v0 = vmul.f32 %v2621_v42, %v2011_v34  ;;  %v2655_v12 = vld [vmem:[%s4622_s9 + $0x38] sm:$0xff] }
0x2cc9   :  { %v2664_v49 = vmul.f32 %v3439_v31, %v2648_v47  ;;  %v2267_v56 = vadd.f32 %v4387_v62, %v2190_v45  ;;  %v2021_v47 = vadd.f32 %v4129_v58, %v4380_v35 }
0x2cca   :  { %v2681_v55 = vadd.f32 %v2665_v9, %v2633_v40  ;;  %v3441_v57 = vadd.f32 %v4298_v17, %v2268_v29  ;;  %v2622_v29 = vld [vmem:[%s4621_s8 + $0x30] sm:$0xff] }
0x2ccb   :  { %v2680_v32 = vadd.f32 %v2664_v49, %v2632_v26  ;;  %v3443_v61 = vadd.f32 %v4300_v44, %v2267_v56  ;;  %v3222_v24 = vpop.f32.mrb[60].mxu0  ;;  %v2006_v44 = vadd.f32 %v4380_v35, %v4127_v41  ;;  %v2652_v41 = vld [vmem:[%s4622_s9 + $0x20] sm:$0xff]  ;;  %v2623_v26 = vld [vmem:[%s4621_s8 + $0x38] sm:$0xff] }
0x2ccc   :  { %2698 = vst.msk [vmem:[%s4623_s10 + $0x8] sm:$0xff] %vm2696_vm6, %v2681_v55  ;;  %v2667_v48 = vmul.f32 %v3441_v57, %v2651_v37  ;;  %v2270_v17 = vadd.f32 %v3222_v24, %v4387_v62  ;;  %v2200_v27 = vpop.f32.mrb[61].mxu0  ;;  %v2639_v56 = vmul.f32 %v2623_v26, %v2021_v47 }
0x2ccd   :  { %2697 = vst.msk [vmem:[%s4623_s10] sm:$0xff] %vm2696_vm6, %v2680_v32  ;;  %v2666_v16 = vmul.f32 %v3443_v61, %v2650_v59  ;;  %v2269_v21 = vadd.f32 %v4387_v62, %v2200_v27  ;;  %v2636_v53 = vmul.f32 %v2620_v50, %v2006_v44  ;;  %v2625_v32 = vld [vmem:[%s4621_s8 + $0x48] sm:$0xff]  ;;  %v2041_v44 = vadd.f32 %v4137_v54, %v4380_v35  ;;  %v2627_v50 = vld [vmem:[%s4621_s8 + $0x58] sm:$0xff] }
0x2cce   :  { %v2683_v52 = vadd.f32 %v2667_v48, %v2635_v33  ;;  %v3445_v39 = vadd.f32 %v4302_v23, %v2270_v17  ;;  %v2657_v61 = vld [vmem:[%s4622_s9 + $0x48] sm:$0xff]  ;;  %v2624_v33 = vld [vmem:[%s4621_s8 + $0x40] sm:$0xff]  ;;  %v2641_v42 = vmul.f32 %v2625_v32, %v2031_v5  ;;  %v2630_v32 = vld [vmem:[%s4621_s8 + $0x70] sm:$0xff] }
0x2ccf   :  { %v2682_v25 = vadd.f32 %v2666_v16, %v2634_v22  ;;  %v3447_v3 = vadd.f32 %v4304_v2, %v2269_v21  ;;  %v3225_v13 = vpop.f32.mrb[62].mxu0  ;;  %v2016_v2 = vadd.f32 %v4380_v35, %v4131_v30  ;;  %v2654_v30 = vld [vmem:[%s4622_s9 + $0x30] sm:$0xff] }
0x2cd0   :  { %2700 = vst.msk [vmem:[%s4623_s10 + $0x18] sm:$0xff] %vm2696_vm6, %v2683_v52  ;;  %v2669_v40 = vmul.f32 %v3445_v39, %v2653_v63  ;;  %v2272_v23 = vadd.f32 %v3225_v13, %v4387_v62  ;;  %v2210_v31 = vpop.f32.mrb[63].mxu0  ;;  %v2659_v52 = vld [vmem:[%s4622_s9 + $0x58] sm:$0xff] }
0x2cd1   :  { %2699 = vst.msk [vmem:[%s4623_s10 + $0x10] sm:$0xff] %vm2696_vm6, %v2682_v25  ;;  %v2668_v58 = vmul.f32 %v3447_v3, %v2652_v41  ;;  %v2271_v9 = vadd.f32 %v4387_v62, %v2210_v31  ;;  %v2638_v59 = vmul.f32 %v2622_v29, %v2016_v2  ;;  %v2626_v41 = vld [vmem:[%s4621_s8 + $0x50] sm:$0xff]  ;;  %v2629_v2 = vld [vmem:[%s4621_s8 + $0x68] sm:$0xff] }
0x2cd2   :  { %v2685_v45 = vadd.f32 %v2669_v40, %v2637_v0  ;;  %v3449_v36 = vadd.f32 %v4306_v20, %v2272_v23  ;;  %v2643_v40 = vmul.f32 %v2627_v50, %v2041_v44  ;;  %v2051_v23 = vadd.f32 %v4141_v46, %v4380_v35 }
0x2cd3   :  { %v2684_v14 = vadd.f32 %v2668_v58, %v2636_v53  ;;  %v3451_v49 = vadd.f32 %v4308_v60, %v2271_v9  ;;  %v3228_v37 = vpop.f32.mrb[64].mxu0  ;;  %v2026_v60 = vadd.f32 %v4380_v35, %v4135_v7  ;;  %v2656_v7 = vld [vmem:[%s4622_s9 + $0x40] sm:$0xff]  ;;  %v2661_v58 = vld [vmem:[%s4622_s9 + $0x68] sm:$0xff] }
0x2cd4   :  { %2702 = vst.msk [vmem:[%s4623_s10 + $0x28] sm:$0xff] %vm2696_vm6, %v2685_v45  ;;  %v2671_v55 = vmul.f32 %v3449_v36, %v2655_v12  ;;  %v2274_v20 = vadd.f32 %v3228_v37, %v4387_v62  ;;  %v2220_v57 = vpop.f32.mrb[65].mxu0  ;;  %v2628_v9 = vld [vmem:[%s4621_s8 + $0x60] sm:$0xff]  ;;  %v2061_v37 = vadd.f32 %v4375_v4, %v4380_v35 }
0x2cd5   :  { %2701 = vst.msk [vmem:[%s4623_s10 + $0x20] sm:$0xff] %vm2696_vm6, %v2684_v14  ;;  %v2670_v6 = vmul.f32 %v3451_v49, %v2654_v30  ;;  %v2273_v24 = vadd.f32 %v4387_v62, %v2220_v57  ;;  %v2640_v21 = vmul.f32 %v2624_v33, %v2026_v60  ;;  %v2645_v49 = vmul.f32 %v2629_v2, %v2051_v23  ;;  %v2663_v57 = vld [vmem:[%s4622_s9 + $0x78] sm:$0xff] }
0x2cd6   :  { %v2687_v34 = vadd.f32 %v2671_v55, %v2639_v56  ;;  %v3453_v48 = vadd.f32 %v4310_v43, %v2274_v20  ;;  %v2631_v20 = vld [vmem:[%s4621_s8 + $0x78] sm:$0xff] }
0x2cd7   :  { %v2686_v17 = vadd.f32 %v2670_v6, %v2638_v59  ;;  %v3455_v27 = vadd.f32 %v4312_v1, %v2273_v24  ;;  %v3231_v22 = vpop.f32.mrb[66].mxu0  ;;  %v2036_v1 = vadd.f32 %v4380_v35, %v4139_v8  ;;  %v2658_v8 = vld [vmem:[%s4622_s9 + $0x50] sm:$0xff]  ;;  %v2647_v24 = vmul.f32 %v2631_v20, %v2061_v37 }
0x2cd8   :  { %2704 = vst.msk [vmem:[%s4623_s10 + $0x38] sm:$0xff] %vm2696_vm6, %v2687_v34  ;;  %v2673_v16 = vmul.f32 %v3453_v48, %v2657_v61  ;;  %v2276_v43 = vadd.f32 %v3231_v22, %v4387_v62  ;;  %v2230_v63 = vpop.f32.mrb[67].mxu0 }
0x2cd9   :  { %2703 = vst.msk [vmem:[%s4623_s10 + $0x30] sm:$0xff] %vm2696_vm6, %v2686_v17  ;;  %v2672_v54 = vmul.f32 %v3455_v27, %v2656_v7  ;;  %v2275_v39 = vadd.f32 %v4387_v62, %v2230_v63  ;;  %v2642_v26 = vmul.f32 %v2626_v41, %v2036_v1 }
0x2cda   :  { %v2689_v25 = vadd.f32 %v2673_v16, %v2641_v42  ;;  %v3457_v3 = vadd.f32 %v4314_v28, %v2276_v43 }
0x2cdb   :  { %v2688_v13 = vadd.f32 %v2672_v54, %v2640_v21  ;;  %v3459_v0 = vadd.f32 %v4316_v51, %v2275_v39  ;;  %v3234_v47 = vpop.f32.mrb[68].mxu0  ;;  %v2046_v51 = vadd.f32 %v4380_v35, %v4143_v10  ;;  %v2660_v10 = vld [vmem:[%s4622_s9 + $0x60] sm:$0xff] }
0x2cdc   :  { %2706 = vst.msk [vmem:[%s4623_s10 + $0x48] sm:$0xff] %vm2696_vm6, %v2689_v25  ;;  %v2675_v31 = vmul.f32 %v3457_v3, %v2659_v52  ;;  %v2278_v28 = vadd.f32 %v3234_v47, %v4387_v62  ;;  %v2240_v53 = vpop.f32.mrb[69].mxu0 }
0x2cdd   :  { %2705 = vst.msk [vmem:[%s4623_s10 + $0x40] sm:$0xff] %vm2696_vm6, %v2688_v13  ;;  %v2674_v46 = vmul.f32 %v3459_v0, %v2658_v8  ;;  %v2277_v12 = vadd.f32 %v4387_v62, %v2240_v53  ;;  %v2644_v55 = vmul.f32 %v2628_v9, %v2046_v51 }
0x2cde   :  { %v2691_v29 = vadd.f32 %v2675_v31, %v2643_v40  ;;  %v3461_v45 = vadd.f32 %v4318_v11, %v2278_v28 }
0x2cdf   :  { %v2690_v36 = vadd.f32 %v2674_v46, %v2642_v26  ;;  %v3463_v30 = vadd.f32 %v4320_v15, %v2277_v12  ;;  %v3237_v14 = vpop.f32.mrb[70].mxu0  ;;  %v2056_v15 = vadd.f32 %v4380_v35, %v4382_v38  ;;  %v2662_v35 = vld [vmem:[%s4622_s9 + $0x70] sm:$0xff] }
0x2ce0   :  { %2708 = vst.msk [vmem:[%s4623_s10 + $0x58] sm:$0xff] %vm2696_vm6, %v2691_v29  ;;  %v2677_v56 = vmul.f32 %v3461_v45, %v2661_v58  ;;  %v2280_v11 = vadd.f32 %v3237_v14, %v4387_v62  ;;  %v2250_v5 = vpop.f32.mrb[71].mxu0 }
0x2ce1   :  { %2707 = vst.msk [vmem:[%s4623_s10 + $0x50] sm:$0xff] %vm2696_vm6, %v2690_v36  ;;  %v2676_v4 = vmul.f32 %v3463_v30, %v2660_v10  ;;  %v2279_v59 = vadd.f32 %v4387_v62, %v2250_v5  ;;  %v2646_v33 = vmul.f32 %v2630_v32, %v2056_v15 }
0x2ce2   :  { %v2693_v60 = vadd.f32 %v2677_v56, %v2645_v49  ;;  %v3465_v6 = vadd.f32 %v4322_v18, %v2280_v11 }
0x2ce3   :  { %v2692_v38 = vadd.f32 %v2676_v4, %v2644_v55  ;;  %v3467_v61 = vadd.f32 %v4324_v19, %v2279_v59 }
0x2ce4   :  { %2710 = vst.msk [vmem:[%s4623_s10 + $0x68] sm:$0xff] %vm2696_vm6, %v2693_v60  ;;  %v2679_v62 = vmul.f32 %v3465_v6, %v2663_v57 }
0x2ce5   :  { %2709 = vst.msk [vmem:[%s4623_s10 + $0x60] sm:$0xff] %vm2696_vm6, %v2692_v38  ;;  %v2678_v18 = vmul.f32 %v3467_v61, %v2662_v35 }
0x2ce6   :  { %v2695_v34 = vadd.f32 %v2679_v62, %v2647_v24 }
0x2ce7   :  { %v2694_v48 = vadd.f32 %v2678_v18, %v2646_v33 }
0x2ce8   :  { %2712 = vst.msk [vmem:[%s4623_s10 + $0x78] sm:$0xff] %vm2696_vm6, %v2695_v34 }
0x2ce9   :  { %2711 = vst.msk [vmem:[%s4623_s10 + $0x70] sm:$0xff] %vm2696_vm6, %v2694_v48 }

</bundles_post_ra>
